<compile_context>
chip_gen: v7x
topology: tpu7x:2x2x1
jax: 0.10.0
libtpu: 0.0.40
codegen_flags: <defaults>
</compile_context>

<pallas_src>
import jax
import jax.numpy as jnp
from jax.experimental import pallas as pl
from jax.experimental.pallas import tpu as pltpu


# ---------------------------------------------------------------------------
# Kernel A: 1x1 conv (no bias) + per-(batch, channel) partial statistics.
# ---------------------------------------------------------------------------
def _conv1x1_stats_kernel(x_ref, w_ref, y_ref, psum_ref, psq_ref):
    t = pl.program_id(1)

    # Stats block is revisited across the HW-tile axis: zero it on first tile.
    @pl.when(t == 0)
    def _():
        psum_ref[...] = jnp.zeros_like(psum_ref)
        psq_ref[...] = jnp.zeros_like(psq_ref)

    x = x_ref[0]            # (Cin, T)
    w = w_ref[...]          # (Cout, Cin)
    # 1x1 conv == channel matmul; MXU with f32 accumulation.
    y = jnp.dot(w, x, preferred_element_type=jnp.float32)    # (Cout, T) f32

    y_ref[0] = y.astype(y_ref.dtype)
    psum_ref[0] += jnp.sum(y, axis=-1, keepdims=True)        # (Cout, 1)
    psq_ref[0] += jnp.sum(y * y, axis=-1, keepdims=True)     # (Cout, 1)


# ---------------------------------------------------------------------------
# Kernel B: apply BatchNorm affine  out = y * scale + shift  (per channel).
# ---------------------------------------------------------------------------
def _bn_apply_kernel(y_ref, scale_ref, shift_ref, o_ref):
    y = y_ref[0]                                              # (Cout, T)
    o_ref[0] = (y * scale_ref[...] + shift_ref[...]).astype(o_ref.dtype)


def _pick_lane_tile(hw, col_bytes, *, budget_bytes=8 * 1024 * 1024, max_tile=2048):
    """Largest multiple of 128 that divides hw, fits a double-buffered VMEM
    budget (col_bytes = bytes per lane-column across all buffered arrays),
    capped at max_tile.  Falls back to the full extent when hw is not
    128-aligned (allowed: block dim equals the full array dim)."""
    if hw % 128 != 0:
        return hw
    cap = max(128, (budget_bytes // max(col_bytes, 1)) // 128 * 128)
    t = min(max_tile, hw, cap)
    t -= t % 128
    t = max(t, 128)
    while hw % t != 0:
        t -= 128
    return t


def embed_forward(x, conv_w, gamma, beta, *, eps=1e-5):
    """Forward pass of `Embed`: 1x1 conv (no bias) followed by BatchNorm2d
    (training-mode batch statistics, affine gamma/beta); heavy work in Pallas
    TPU kernels."""
    N, Cin, H, W = x.shape
    Cout = conv_w.shape[0]
    HW = H * W

    x3 = x.reshape(N, Cin, HW)
    w2 = conv_w.reshape(Cout, Cin).astype(jnp.float32)

    # Intermediate conv-output dtype: keep f32 for f32 inputs, otherwise use
    # the (16-bit) input dtype to halve the HBM round-trip of the intermediate.
    y_dtype = jnp.float32 if x.dtype == jnp.float32 else x.dtype
    xb = x.dtype.itemsize
    yb = jnp.dtype(y_dtype).itemsize
    ob = x.dtype.itemsize

    # Double-buffered bytes per lane column for each kernel.
    Ta = _pick_lane_tile(HW, 2 * (Cin * xb + Cout * yb))
    Tb = _pick_lane_tile(HW, 2 * (Cout * yb + Cout * ob))
    n_ta = HW // Ta
    n_tb = HW // Tb

    conv_cost = pl.CostEstimate(
        flops=int(2 * N * HW * Cin * Cout + 3 * N * Cout * HW),
        transcendentals=0,
        bytes_accessed=int(N * Cin * HW * xb + Cin * Cout * 4
                           + N * Cout * HW * yb + 2 * N * Cout * 4),
    )

    y3, psum, psq = pl.pallas_call(
        _conv1x1_stats_kernel,
        out_shape=(
            jax.ShapeDtypeStruct((N, Cout, HW), y_dtype),       # conv output
            jax.ShapeDtypeStruct((N, Cout, 1), jnp.float32),    # per-batch sum(y)
            jax.ShapeDtypeStruct((N, Cout, 1), jnp.float32),    # per-batch sum(y*y)
        ),
        grid_spec=pltpu.PrefetchScalarGridSpec(
            num_scalar_prefetch=0,
            grid=(N, n_ta),
            in_specs=[
                pl.BlockSpec((1, Cin, Ta), lambda n, t: (n, 0, t)),
                pl.BlockSpec((Cout, Cin), lambda n, t: (0, 0)),      # weight resident
            ],
            out_specs=(
                pl.BlockSpec((1, Cout, Ta), lambda n, t: (n, 0, t)),
                pl.BlockSpec((1, Cout, 1), lambda n, t: (n, 0, 0)),  # accumulated over t
                pl.BlockSpec((1, Cout, 1), lambda n, t: (n, 0, 0)),  # accumulated over t
            ),
        ),
        compiler_params=pltpu.CompilerParams(
            dimension_semantics=("parallel", "arbitrary"),
        ),
        cost_estimate=conv_cost,
    )(x3, w2)

    # Finalize training-mode BatchNorm2d statistics (tiny, Cout-sized math).
    count = float(N * HW)
    s = jnp.sum(psum[:, :, 0], axis=0)                     # (Cout,)
    sq = jnp.sum(psq[:, :, 0], axis=0)                     # (Cout,)
    mean = s / count
    var = jnp.maximum(sq / count - mean * mean, 0.0)       # biased variance (PyTorch BN)
    inv_std = jax.lax.rsqrt(var + eps)                     # rsqrt: no sqrt + divide
    gamma32 = gamma.astype(jnp.float32)
    beta32 = beta.astype(jnp.float32)
    scale = (gamma32 * inv_std).reshape(Cout, 1)
    shift = (beta32 - mean * gamma32 * inv_std).reshape(Cout, 1)

    bn_cost = pl.CostEstimate(
        flops=int(2 * N * Cout * HW),
        transcendentals=0,
        bytes_accessed=int(N * Cout * HW * (yb + ob) + 2 * Cout * 4),
    )

    out3 = pl.pallas_call(
        _bn_apply_kernel,
        out_shape=jax.ShapeDtypeStruct((N, Cout, HW), x.dtype),
        grid_spec=pltpu.PrefetchScalarGridSpec(
            num_scalar_prefetch=0,
            grid=(N, n_tb),
            in_specs=[
                pl.BlockSpec((1, Cout, Tb), lambda n, t: (n, 0, t)),
                pl.BlockSpec((Cout, 1), lambda n, t: (0, 0)),
                pl.BlockSpec((Cout, 1), lambda n, t: (0, 0)),
            ],
            out_specs=pl.BlockSpec((1, Cout, Tb), lambda n, t: (n, 0, t)),
        ),
        compiler_params=pltpu.CompilerParams(
            dimension_semantics=("parallel", "parallel"),
        ),
        cost_estimate=bn_cost,
    )(y3, scale, shift)

    return out3.reshape(N, Cout, H, W)


if __name__ == "__main__":
    key = jax.random.PRNGKey(0)
    k1, k2, k3, k4 = jax.random.split(key, 4)

    # Module defaults: dim_in=256, dim_out=128; small batch / spatial extent.
    N, Cin, Cout, H, W = 2, 256, 128, 32, 32
    x = jax.random.normal(k1, (N, Cin, H, W), dtype=jnp.float32)
    conv_w = jax.random.normal(k2, (Cout, Cin, 1, 1), dtype=jnp.float32) * (Cin ** -0.5)
    gamma = 1.0 + 0.1 * jax.random.normal(k3, (Cout,), dtype=jnp.float32)  # BN weight
    beta = 0.1 * jax.random.normal(k4, (Cout,), dtype=jnp.float32)         # BN bias

    out = embed_forward(x, conv_w, gamma, beta)
    out = jax.block_until_ready(out)

    # Pure-JAX reference: conv1x1 (no bias) -> training-mode BatchNorm2d.
    w2 = conv_w.reshape(Cout, Cin)
    y = jnp.einsum("oc,nchw->nohw", w2, x, precision=jax.lax.Precision.HIGHEST)
    mean = jnp.mean(y, axis=(0, 2, 3), keepdims=True)
    var = jnp.var(y, axis=(0, 2, 3), keepdims=True)
    ref = (gamma.reshape(1, Cout, 1, 1) * (y - mean) * jax.lax.rsqrt(var + 1e-5)
           + beta.reshape(1, Cout, 1, 1))

    assert out.shape == (N, Cout, H, W)
    assert out.dtype == x.dtype
    # Tolerance accounts for possible reduced-precision MXU passes on f32 matmuls.
    assert jnp.allclose(out, ref, atol=3e-2, rtol=3e-2), float(jnp.max(jnp.abs(out - ref)))

    print("KERNEL_OK")
</pallas_src>

<mosaic_0001>
module attributes {stable_mosaic.version = 11 : i64} {
  func.func @_conv1x1_stats_kernel(%arg0: i32, %arg1: i32, %arg2: memref<1x256x1024xf32, #tpu.memory_space<vmem>>, %arg3: memref<128x256xf32, #tpu.memory_space<vmem>>, %arg4: memref<1x128x1024xf32, #tpu.memory_space<vmem>>, %arg5: memref<1x128x1xf32, #tpu.memory_space<vmem>>, %arg6: memref<1x128x1xf32, #tpu.memory_space<vmem>>) attributes {dimension_semantics = [#tpu.dimension_semantics<parallel>, #tpu.dimension_semantics<arbitrary>], iteration_bounds = array<i64: 2, 1>, scalar_prefetch = 0 : i64, scratch_operands = 0 : i64, tpu.core_type = #tpu.core_type<tc>, window_params = [{transform_indices = @transform_0, window_bounds = array<i64: 1, 256, 1024>}, {pipeline_mode = #tpu.pipeline_mode<synchronous>, transform_indices = @transform_1, window_bounds = array<i64: 128, 256>}, {transform_indices = @transform_2, window_bounds = array<i64: 1, 128, 1024>}, {transform_indices = @transform_3, window_bounds = array<i64: 1, 128, 1>}, {transform_indices = @transform_4, window_bounds = array<i64: 1, 128, 1>}]} {
    %c0_i32 = arith.constant 0 : i32
    %0 = arith.cmpi eq, %arg1, %c0_i32 : i32
    %1 = arith.extui %0 : i1 to i32
    %c0_i32_0 = arith.constant 0 : i32
    %2 = arith.cmpi ne, %1, %c0_i32_0 : i32
    scf.if %2 {
      %cst_22 = arith.constant 0.000000e+00 : f32
      %27 = vector.broadcast %cst_22 : f32 to vector<1x128x1xf32>
      %c0_23 = arith.constant 0 : index
      %c0_24 = arith.constant 0 : index
      %c0_25 = arith.constant 0 : index
      %28 = vector.load %arg5[%c0_23, %c0_24, %c0_25] : memref<1x128x1xf32, #tpu.memory_space<vmem>>, vector<1x128x1xf32>
      tpu.vector_store %arg5[%c0_23, %c0_24, %c0_25], %27 {strides = array<i32>} : memref<1x128x1xf32, #tpu.memory_space<vmem>>, vector<1x128x1xf32>,
      %cst_26 = arith.constant 0.000000e+00 : f32
      %29 = vector.broadcast %cst_26 : f32 to vector<1x128x1xf32>
      %c0_27 = arith.constant 0 : index
      %c0_28 = arith.constant 0 : index
      %c0_29 = arith.constant 0 : index
      %30 = vector.load %arg6[%c0_27, %c0_28, %c0_29] : memref<1x128x1xf32, #tpu.memory_space<vmem>>, vector<1x128x1xf32>
      tpu.vector_store %arg6[%c0_27, %c0_28, %c0_29], %29 {strides = array<i32>} : memref<1x128x1xf32, #tpu.memory_space<vmem>>, vector<1x128x1xf32>,
    } else {
    }
    %c0 = arith.constant 0 : index
    %c0_1 = arith.constant 0 : index
    %c0_2 = arith.constant 0 : index
    %3 = vector.load %arg2[%c0, %c0_1, %c0_2] : memref<1x256x1024xf32, #tpu.memory_space<vmem>>, vector<1x256x1024xf32>
    %4 = vector.shape_cast %3 : vector<1x256x1024xf32> to vector<256x1024xf32>
    %c0_3 = arith.constant 0 : index
    %c0_4 = arith.constant 0 : index
    %5 = vector.load %arg3[%c0_3, %c0_4] : memref<128x256xf32, #tpu.memory_space<vmem>>, vector<128x256xf32>
    %cst = arith.constant dense<0.000000e+00> : vector<128x1024xf32>
    %6 = tpu.matmul %5, %4, %cst {dimension_numbers = #tpu.dot_dimension_numbers<[1], [0], [0], [1], [0, 0, 1, 1], [], []>} : vector<128x256xf32>, vector<256x1024xf32>, vector<128x1024xf32> -> vector<128x1024xf32>
    %c0_5 = arith.constant 0 : index
    %c0_6 = arith.constant 0 : index
    %c0_7 = arith.constant 0 : index
    %7 = vector.load %arg4[%c0_5, %c0_6, %c0_7] : memref<1x128x1024xf32, #tpu.memory_space<vmem>>, vector<1x128x1024xf32>
    %8 = vector.shape_cast %7 : vector<1x128x1024xf32> to vector<128x1024xf32>
    %9 = vector.shape_cast %6 : vector<128x1024xf32> to vector<1x128x1024xf32>
    tpu.vector_store %arg4[%c0_5, %c0_6, %c0_7], %9 {strides = array<i32>} : memref<1x128x1024xf32, #tpu.memory_space<vmem>>, vector<1x128x1024xf32>,
    %c0_8 = arith.constant 0 : index
    %c0_9 = arith.constant 0 : index
    %c0_10 = arith.constant 0 : index
    %10 = vector.load %arg5[%c0_8, %c0_9, %c0_10] : memref<1x128x1xf32, #tpu.memory_space<vmem>>, vector<1x128x1xf32>
    %11 = vector.shape_cast %10 : vector<1x128x1xf32> to vector<128x1xf32>
    %cst_11 = arith.constant dense<0.000000e+00> : vector<128xf32>
    %12 = vector.multi_reduction <add>, %6, %cst_11 [1] : vector<128x1024xf32> to vector<128xf32>
    %13 = vector.shape_cast %12 : vector<128xf32> to vector<128x1xf32>
    %14 = arith.addf %11, %13 : vector<128x1xf32>
    %c0_12 = arith.constant 0 : index
    %c0_13 = arith.constant 0 : index
    %c0_14 = arith.constant 0 : index
    %15 = vector.load %arg5[%c0_12, %c0_13, %c0_14] : memref<1x128x1xf32, #tpu.memory_space<vmem>>, vector<1x128x1xf32>
    %16 = vector.shape_cast %15 : vector<1x128x1xf32> to vector<128x1xf32>
    %17 = vector.shape_cast %14 : vector<128x1xf32> to vector<1x128x1xf32>
    tpu.vector_store %arg5[%c0_12, %c0_13, %c0_14], %17 {strides = array<i32>} : memref<1x128x1xf32, #tpu.memory_space<vmem>>, vector<1x128x1xf32>,
    %c0_15 = arith.constant 0 : index
    %c0_16 = arith.constant 0 : index
    %c0_17 = arith.constant 0 : index
    %18 = vector.load %arg6[%c0_15, %c0_16, %c0_17] : memref<1x128x1xf32, #tpu.memory_space<vmem>>, vector<1x128x1xf32>
    %19 = vector.shape_cast %18 : vector<1x128x1xf32> to vector<128x1xf32>
    %20 = arith.mulf %6, %6 : vector<128x1024xf32>
    %cst_18 = arith.constant dense<0.000000e+00> : vector<128xf32>
    %21 = vector.multi_reduction <add>, %20, %cst_18 [1] : vector<128x1024xf32> to vector<128xf32>
    %22 = vector.shape_cast %21 : vector<128xf32> to vector<128x1xf32>
    %23 = arith.addf %19, %22 : vector<128x1xf32>
    %c0_19 = arith.constant 0 : index
    %c0_20 = arith.constant 0 : index
    %c0_21 = arith.constant 0 : index
    %24 = vector.load %arg6[%c0_19, %c0_20, %c0_21] : memref<1x128x1xf32, #tpu.memory_space<vmem>>, vector<1x128x1xf32>
    %25 = vector.shape_cast %24 : vector<1x128x1xf32> to vector<128x1xf32>
    %26 = vector.shape_cast %23 : vector<128x1xf32> to vector<1x128x1xf32>
    tpu.vector_store %arg6[%c0_19, %c0_20, %c0_21], %26 {strides = array<i32>} : memref<1x128x1xf32, #tpu.memory_space<vmem>>, vector<1x128x1xf32>,
    return
  }
  func.func @transform_0(%arg0: i32, %arg1: i32) -> (i32, i32, i32) {
    %c0_i32 = arith.constant 0 : i32
    %c0_i32_0 = arith.constant 0 : i32
    return %arg0, %c0_i32, %arg1 : i32, i32, i32
  }
  func.func @transform_1(%arg0: i32, %arg1: i32) -> (i32, i32) {
    %c0_i32 = arith.constant 0 : i32
    %c0_i32_0 = arith.constant 0 : i32
    %c0_i32_1 = arith.constant 0 : i32
    return %c0_i32, %c0_i32_0 : i32, i32
  }
  func.func @transform_2(%arg0: i32, %arg1: i32) -> (i32, i32, i32) {
    %c0_i32 = arith.constant 0 : i32
    %c0_i32_0 = arith.constant 0 : i32
    return %arg0, %c0_i32, %arg1 : i32, i32, i32
  }
  func.func @transform_3(%arg0: i32, %arg1: i32) -> (i32, i32, i32) {
    %c0_i32 = arith.constant 0 : i32
    %c0_i32_0 = arith.constant 0 : i32
    %c0_i32_1 = arith.constant 0 : i32
    return %arg0, %c0_i32, %c0_i32_0 : i32, i32, i32
  }
  func.func @transform_4(%arg0: i32, %arg1: i32) -> (i32, i32, i32) {
    %c0_i32 = arith.constant 0 : i32
    %c0_i32_0 = arith.constant 0 : i32
    %c0_i32_1 = arith.constant 0 : i32
    return %arg0, %c0_i32, %c0_i32_0 : i32, i32, i32
  }
}

</mosaic_0001>

<bundles_post_ra>
// kernel: tpu_custom_call.1
= control target key start
LH: loop header
LB: loop body
LE: loop exit
PB: predicated region body
PF: predicated region fallthrough
CT: control target
= control target key end

     0   :  { %10 = vsyncpa [#allocation3], 0  ;;  %s3715_s0 = inlined_call_operand.hbm [shape: f32[2,256,1024], index: 0, kind: input, shape index: {}]   ;;  %s3716_s1 = inlined_call_operand.hbm [shape: f32[128,256], index: 1, kind: input, shape index: {}]   ;;  %s3717_s2 = inlined_call_operand.hbm [shape: f32[2,128,1024], index: 2, kind: output, shape index: {0}]   ;;  %s3718_s3 = inlined_call_operand.vmem [shape: f32[2,128,1], index: 3, kind: output, shape index: {1}]   ;;  %s3719_s4 = inlined_call_operand.vmem [shape: f32[2,128,1], index: 4, kind: output, shape index: {2}]  }
   0x1   :  { %12 = vsyncpa [#allocation3 + $0x1], 0 }
   0x2   :  { %13 = vsyncpa [#allocation6], 0 }
   0x3   :  { %14 = vsyncpa [#allocation4], 0 }
   0x4   :  { %16 = vsyncpa [#allocation4 + $0x1], 0  ;;  %s2607_s15 = smov 0   ;;  %s2609_s16 = smov 0  }
   0x5   :  { %s2611_s17 = smov 0   ;;  %s2613_s18 = smov 0  }
   0x6   :  { %s2615_s19 = smov 0   ;;  %s2617_s20 = smov 0  }
   0x7 LB: > { %s2065_s21 = sadd.s32 4294967295, %s2570_s20   ;;  %s2066_s22 = sadd.s32 4294967294, %s2570_s20   ;;  %s2570_s20 = sphi %s2617_s20, %s22_s20   ;;  %s2566_s19 = sphi %s2615_s19, %s3743_s19   ;;  %s2562_s18 = sphi %s2613_s18, %s3742_s18   ;;  %s2558_s17 = sphi %s2611_s17, %s3741_s17   ;;  %s2554_s16 = sphi %s2609_s16, %s3740_s16   ;;  %s2550_s15 = sphi %s2607_s15, %s3739_s15  }
   0x8   : > { %p56_p0 = scmp.ne.s32.totalorder %s2554_s16, %s2550_s15  ;;  %p2641_p1 = scmp.eq.s32.totalorder %s2065_s21, 0 }
   0x9   : > { %p2645_p2 = scmp.eq.s32.totalorder %s2065_s21, 1  ;;  %p109_p3 = scmp.eq.s32.totalorder %s2066_s22, 1 }
   0xa   : > { %s3724_s23 = scalar_select %p2641_p1, 1, 0 }
   0xb   : > { %s3725_s24 = scalar_select %p2645_p2, 1, 0 }
   0xc   : > { %p2651_p4 = por %p2641_p1, %p56_p0  ;;  %p2067_p5 = scmp.ge.s32.totalorder %s2570_s20, 1 }
   0xd   : > { %p2656_p6 = por %p109_p3, %p56_p0  ;;  %p168_p7 = scmp.lt.s32.totalorder %s2570_s20, 3 }
   0xe   : > { %s3726_s25 = scalar_select %p2651_p4, 1, 0 }
   0xf   : > { %s3727_s26 = scalar_select %p2656_p6, 1, 0 }
  0x10   : > { %p2661_p8 = pnand %p2067_p5, %p168_p7  ;;  %s2572_s28 = smov [#allocation5]  }
  0x11   : > { %s180_s29 = sshll.u32 %s2572_s28, 4  ;;  %s34_s5 = sadd.s32 1, %s2566_s19  ;;  %s181_s29 = int_to_ptr.vmem [resolvable:$true] %s180_s29 }
  0x12   : > { %s3728_s27 = scalar_select %p2661_p8, 1, 0 }
  0x13   : > { %p2354_p9 = pneg %p2661_p8  ;;  %s2426_s8 = scalar_lea.hbm %s3716_s1, 4096 }
  0x14   : > { %p2427_p12 = scmp.ne.s32.totalorder %s3716_s1, %s2426_s8  ;;  %p2433_p5 = scmp.lt.u32.totalorder %s2426_s8, %s3716_s1 }
  0x15   : > { %p2670_p11 = pnand %p2354_p9, %p2641_p1 }
  0x17   : > { %p2428_p13 = pneg %p2670_p11 }
  0x19   : > { %p2429_p0 = pnand %p2428_p13, %p2427_p12 }
  0x1b   : > { %p2430_p3 = pneg %p2429_p0 }
  0x1d   : > { %p2435_p7 = pnand %p2433_p5, %p2430_p3 }
  0x1f   : > { %2438 = shalt.err (!%p2435_p7)
}
  0x20   : > { %s2439_s13 = scalar_lea.vmem %s181_s29, 4096  ;;  %p2447_p1 = scmp.lt.s32.totalorder %s181_s29, %s181_s29 }
  0x21   : > { %p2440_p9 = scmp.ne.s32.totalorder %s181_s29, %s2439_s13  ;;  %p2448_p4 = scmp.lt.s32.totalorder %s2439_s13, %s2439_s13 }
  0x23   : > { %p2442_p10 = pnand %p2440_p9, %p2428_p13  ;;  %p2449_p8 = por %p2448_p4, %p2447_p1 }
  0x25   : > { %p2443_p6 = pneg %p2442_p10 }
  0x27   : > { %p2450_p2 = pnand %p2449_p8, %p2443_p6 }
  0x29   : > { %2453 = shalt.err (!%p2450_p2)
}
  0x2a   : > { %s2573_s14 = smov 256   ;;  %s2574_s21 = smov 16  }
  0x2b   : > { %2357 = dma.hbm_to_vmem [thread:$0]  (!%p2670_p11), %s3716_s1, 4096, %s181_s29, [#allocation6], %s2573_s14, %s2573_s14, %s2574_s21  }
  0x2c   : > { %p36_p1 = scmp.ge.s32.totalorder %s34_s5, 2  ;;  %s43_s6 = sadd.s32 1, %s2558_s17 }
  0x2d   : > { %p50_p2 = scmp.ne.s32.totalorder %s2558_s17, %s2554_s16  ;;  %p51_p4 = scmp.eq.s32.totalorder %s2570_s20, 0 }
  0x2e   : > { %s3745_s5 = smov (%p36_p1, %s34_s5), 0  ;;  %p3731_p8 = scmp.ne.s32.totalorder %s3725_s24, 0 }
  0x2f   : > { %p2697_p6 = por %p51_p4, %p50_p2  ;;  %s38_s30 = ssub.s32 %s2566_s19, %s3745_s5 }
  0x30   : > { %p2703_p10 = por %p3731_p8, %p50_p2  ;;  %p2367_p12 = scmp.lt.s32.totalorder %s2570_s20, 2 }
  0x31   : > { %p41_p11 = scmp.eq.s32.totalorder %s38_s30, 0  ;;  %s194_s29 = sand.u32 1, %s2558_s17  }
  0x32   : > { %s2070_s9 = sshll.u32 %s194_s29, 11  ;;  %s2086_s11 = sshll.u32 %s2566_s19, 15 }
  0x33   : > { %s2712_s10 = scalar_select %p41_p11, %s2558_s17, %s43_s6  }
  0x34   : > { %s2718_s14 = scalar_lea.hbm %s3715_s0, %s2086_s11  ;;  %s198_s24 = scalar_lea.vmem [#allocation2], %s2070_s9 }
  0x35   : > { %s207_s21 = sshll.u32 %s198_s24, 4  ;;  %p2724_p13 = pnand %p2367_p12, %p2697_p6  ;;  %s2720_s21 = int_to_ptr.vmem [resolvable:$true] %s207_s21 }
  0x36   : > { %s2728_s28 = scalar_lea.sflag [#allocation3], %s194_s29  ;;  %s2454_s6 = scalar_lea.hbm %s2718_s14, 32768 }
  0x37   : > { %p2455_p0 = scmp.ne.s32.totalorder %s2718_s14, %s2454_s6  ;;  %p2456_p3 = pneg %p2724_p13 }
  0x38   : > { %s2459_s7 = scalar_lea.hbm %s3715_s0, 65536  ;;  %p2460_p9 = scmp.lt.u32.totalorder %s2718_s14, %s3715_s0 }
  0x39   : > { %p2457_p5 = pnand %p2456_p3, %p2455_p0  ;;  %p2461_p1 = scmp.lt.u32.totalorder %s2459_s7, %s2454_s6 }
  0x3a   : > { %p2463_p4 = scmp.lt.u32.totalorder %s2454_s6, %s2718_s14 }
  0x3b   : > { %p2458_p7 = pneg %p2457_p5  ;;  %p2462_p2 = por %p2461_p1, %p2460_p9 }
  0x3d   : > { %p2464_p6 = por %p2463_p4, %p2462_p2 }
  0x3f   : > { %p2465_p8 = pnand %p2464_p6, %p2458_p7 }
  0x41   : > { %2468 = shalt.err (!%p2465_p8)
}
  0x42   : > { %s2469_s29 = scalar_lea.vmem %s2720_s21, 32768  ;;  %s2575_s13 = smov [#allocation2]  }
  0x43   : > { %p2470_p12 = scmp.ne.s32.totalorder %s2720_s21, %s2469_s29  ;;  %s2474_s24 = sshll.u32 %s2575_s13, 4  ;;  %s2475_s24 = int_to_ptr.vmem [resolvable:$false] %s2474_s24 }
  0x44   : > { %s2476_s30 = scalar_lea.vmem %s2475_s24, 65536  ;;  %p2477_p5 = scmp.lt.s32.totalorder %s2720_s21, %s2475_s24 }
  0x45   : > { %p2472_p11 = pnand %p2470_p12, %p2456_p3  ;;  %p2478_p9 = scmp.lt.s32.totalorder %s2476_s30, %s2469_s29 }
  0x47   : > { %p2473_p0 = pneg %p2472_p11  ;;  %p2479_p1 = por %p2478_p9, %p2477_p5 }
  0x49   : > { %p2480_p2 = pnand %p2479_p1, %p2473_p0 }
  0x4b   : > { %2483 = shalt.err (!%p2480_p2)
}
  0x4c   : > { %s2576_s6 = smov 1024   ;;  %s2577_s9 = smov 64  }
  0x4d   : > { %2361 = dma.hbm_to_vmem [thread:$0]  (!%p2724_p13), %s2718_s14, 32768, %s2720_s21, %s2728_s28, %s2576_s6, %s2576_s6, %s2577_s9  }
  0x4e   : > { %p3734_p3 = scmp.ne.s32.totalorder %s3728_s27, 0 }
  0x4f   : > { %s2759_s7 = sand.u32 (!%p3734_p3), 1, %s2554_s16   ;;  %p3735_p7 = scmp.ne.s32.totalorder (!%p3734_p3), %s3726_s25, 0 }
  0x50   : > { %219 = sbr.rel (%p3734_p3) target bundleno = 654 (0x28e), region = 28  ;;  %s2074_s11 = sshll.u32 (!%p3734_p3), %s2759_s7, 11 }
  0x51   : > { %s222_s12 = scalar_lea.sflag (!%p3734_p3), [#allocation3], %s2759_s7  ;;  %s2763_s29 = scalar_lea.vmem (!%p3734_p3), [#allocation2], %s2074_s11 }
  0x57   : > { %2537 = dma.done.wait (%p3735_p7), %s222_s12, 32768  }
  0x58   : > { %2539 = vsyncadd (%p3735_p7), %s222_s12, 4294934528  ;;  %p3736_p13 = scmp.ne.s32.totalorder %s3724_s23, 0 }
  0x5a   : > { %2541 = dma.done.wait (%p3736_p13), [#allocation6], 4096  }
  0x5b   : > { %2543 = vsyncadd (%p3736_p13), [#allocation6], 4294963200  ;;  %v314_v0 = vld [vmem:[%s2763_s29 + $0x8] sm:$0xff]  ;;  %v313_v2 = vld [vmem:[%s2763_s29] sm:$0xff]  ;;  %s2076_s23 = sshll.u32 %s2759_s7, 10  ;;  %p266_p4 = scmp.lt.s32.totalorder %s2562_s18, 1 }
  0x5c   : > { %v322_v1 = vld [vmem:[%s2763_s29 + $0x48] sm:$0xff]  ;;  %v321_v4 = vld [vmem:[%s2763_s29 + $0x40] sm:$0xff]  ;;  %v316_v5 = vld [vmem:[%s2763_s29 + $0x18] sm:$0xff]  ;;  %s3222_s25 = scalar_lea.vmem [#allocation7], %s2076_s23  ;;  %vm280_vm0 = vcmask 7168   ;;  %s2089_s6 = sshll.u32 %s2562_s18, 14 }
  0x5d   : > { %v2090_v3 = vpack.c.bf16 %v322_v1, %v314_v0  ;;  %v324_v6 = vld [vmem:[%s2763_s29 + $0x58] sm:$0xff]  ;;  %v2092_v7 = vpack.c.bf16 %v321_v4, %v313_v2  ;;  %v330_v9 = vld [vmem:[%s2763_s29 + $0x88] sm:$0xff]  ;;  %v315_v11 = vld [vmem:[%s2763_s29 + $0x10] sm:$0xff]  ;;  %s3247_s27 = scalar_select %p266_p4, %s2562_s18, 1 }
  0x5e   : > { %v2154_v8 = vpack.c.bf16 %v324_v6, %v316_v5  ;;  %v338_v10 = vld [vmem:[%s2763_s29 + $0xc8] sm:$0xff]  ;;  %v323_v13 = vld [vmem:[%s2763_s29 + $0x50] sm:$0xff]  ;;  %v329_v14 = vld [vmem:[%s2763_s29 + $0x80] sm:$0xff]  ;;  %s1912_s9 = sshll.u32 %s3222_s25, 4  ;;  %s1887_s23 = scalar_lea.sflag [#allocation4], %s2759_s7  ;;  %s3570_s9 = int_to_ptr.vmem [resolvable:$true] %s1912_s9 }
  0x5f   : > { %2091 = vmatprep.subr.bf16.mxu0 %v2090_v3  ;;  %v2094_v12 = vpack.c.bf16 %v338_v10, %v330_v9  ;;  %v337_v15 = vld [vmem:[%s2763_s29 + $0xc0] sm:$0xff]  ;;  %v2156_v16 = vpack.c.bf16 %v323_v13, %v315_v11  ;;  %v332_v18 = vld [vmem:[%s2763_s29 + $0x98] sm:$0xff]  ;;  %v346_v20 = vld [vmem:[%s2763_s29 + $0x108] sm:$0xff]  ;;  %s2087_s14 = sshll.u32 %s3247_s27, 7  ;;  %s2484_s27 = scalar_lea.vmem %s3570_s9, 16384 }
  0x60   : > { %2093 = vmatpush1.bf16.msra.mxu0 %v2092_v7  ;;  %2155 = vmatprep.subr.bf16.mxu1 %v2154_v8  ;;  %v2096_v17 = vpack.c.bf16 %v337_v15, %v329_v14  ;;  %v340_v19 = vld [vmem:[%s2763_s29 + $0xd8] sm:$0xff]  ;;  %v354_v22 = vld [vmem:[%s2763_s29 + $0x148] sm:$0xff]  ;;  %v331_v23 = vld [vmem:[%s2763_s29 + $0x90] sm:$0xff]  ;;  %s3262_s28 = scalar_lea.vmem %s3718_s3, %s2087_s14  ;;  %s3446_s30 = scalar_lea.vmem %s3719_s4, %s2087_s14 }
  0x61   : > { %2095 = vmatprep.subr.bf16.mxu0 %v2094_v12  ;;  %v2158_v21 = vpack.c.bf16 %v340_v19, %v332_v18  ;;  %v339_v24 = vld [vmem:[%s2763_s29 + $0xd0] sm:$0xff]  ;;  %2157 = vmatpush1.bf16.msra.mxu1 %v2156_v16  ;;  %v2098_v25 = vpack.c.bf16 %v354_v22, %v346_v20  ;;  %v345_v27 = vld [vmem:[%s2763_s29 + $0x100] sm:$0xff]  ;;  %v348_v29 = vld [vmem:[%s2763_s29 + $0x118] sm:$0xff]  ;;  %p2485_p6 = scmp.ne.s32.totalorder %s3570_s9, %s2484_s27  ;;  %s2579_s14 = smov [#allocation7]  }
  0x62   : > { %v2160_v26 = vpack.c.bf16 %v339_v24, %v331_v23  ;;  %v353_v28 = vld [vmem:[%s2763_s29 + $0x140] sm:$0xff]  ;;  %v356_v30 = vld [vmem:[%s2763_s29 + $0x158] sm:$0xff]  ;;  %v362_v31 = vld [vmem:[%s2763_s29 + $0x188] sm:$0xff]  ;;  %s2488_s21 = sshll.u32 %s2579_s14, 4  ;;  %s2489_s21 = int_to_ptr.vmem [resolvable:$false] %s2488_s21 }
  0x63   : > { %2159 = vmatprep.subr.bf16.mxu1 %v2158_v21  ;;  %v370_v32 = vld [vmem:[%s2763_s29 + $0x1c8] sm:$0xff]  ;;  %v2100_v33 = vpack.c.bf16 %v353_v28, %v345_v27  ;;  %v2162_v34 = vpack.c.bf16 %v356_v30, %v348_v29  ;;  %v347_v35 = vld [vmem:[%s2763_s29 + $0x110] sm:$0xff]  ;;  %v361_v37 = vld [vmem:[%s2763_s29 + $0x180] sm:$0xff]  ;;  %p2486_p8 = pnand %p2485_p6, %p2703_p10  ;;  %s2490_s18 = scalar_lea.vmem %s2489_s21, 32768 }
  0x64   : > { %2097 = vmatpush1.bf16.msra.mxu0 %v2096_v17  ;;  %v355_v36 = vld [vmem:[%s2763_s29 + $0x150] sm:$0xff]  ;;  %v2102_v38 = vpack.c.bf16 %v370_v32, %v362_v31  ;;  %v369_v39 = vld [vmem:[%s2763_s29 + $0x1c0] sm:$0xff]  ;;  %v364_v40 = vld [vmem:[%s2763_s29 + $0x198] sm:$0xff]  ;;  %p2491_p11 = scmp.lt.s32.totalorder %s3570_s9, %s2489_s21  ;;  %p2492_p0 = scmp.lt.s32.totalorder %s2490_s18, %s2484_s27 }
  0x65   : > { %2099 = vmatprep.subr.bf16.mxu0 %v2098_v25  ;;  %v372_v41 = vld [vmem:[%s2763_s29 + $0x1d8] sm:$0xff]  ;;  %2161 = vmatpush1.bf16.msra.mxu1 %v2160_v26  ;;  %v2164_v42 = vpack.c.bf16 %v355_v36, %v347_v35  ;;  %v378_v43 = vld [vmem:[%s2763_s29 + $0x208] sm:$0xff]  ;;  %v363_v46 = vld [vmem:[%s2763_s29 + $0x190] sm:$0xff]  ;;  %v2104_v48 = vpack.c.bf16 %v369_v39, %v361_v37  ;;  %p2487_p12 = pneg %p2486_p8 }
  0x66   : > { %v386_v44 = vld [vmem:[%s2763_s29 + $0x248] sm:$0xff]  ;;  %2163 = vmatprep.subr.bf16.mxu1 %v2162_v34  ;;  %v2166_v45 = vpack.c.bf16 %v372_v41, %v364_v40  ;;  %v371_v47 = vld [vmem:[%s2763_s29 + $0x1d0] sm:$0xff]  ;;  %v380_v49 = vld [vmem:[%s2763_s29 + $0x218] sm:$0xff]  ;;  %p2493_p5 = por %p2492_p0, %p2491_p11 }
  0x67   : > { %v388_v50 = vld [vmem:[%s2763_s29 + $0x258] sm:$0xff]  ;;  %v2106_v51 = vpack.c.bf16 %v386_v44, %v378_v43  ;;  %v377_v52 = vld [vmem:[%s2763_s29 + $0x200] sm:$0xff]  ;;  %v2168_v54 = vpack.c.bf16 %v371_v47, %v363_v46  ;;  %v394_v55 = vld [vmem:[%s2763_s29 + $0x288] sm:$0xff] }
  0x68   : > { %2101 = vmatpush1.bf16.msra.mxu0 %v2100_v33  ;;  %v385_v53 = vld [vmem:[%s2763_s29 + $0x240] sm:$0xff]  ;;  %v402_v56 = vld [vmem:[%s2763_s29 + $0x2c8] sm:$0xff]  ;;  %v2170_v57 = vpack.c.bf16 %v388_v50, %v380_v49  ;;  %v379_v58 = vld [vmem:[%s2763_s29 + $0x210] sm:$0xff]  ;;  %p2494_p9 = pnand %p2493_p5, %p2487_p12 }
  0x69   : > { %2103 = vmatprep.subr.bf16.mxu0 %v2102_v38  ;;  %2165 = vmatpush1.bf16.msra.mxu1 %v2164_v42  ;;  %v387_v59 = vld [vmem:[%s2763_s29 + $0x250] sm:$0xff]  ;;  %v2108_v60 = vpack.c.bf16 %v385_v53, %v377_v52  ;;  %v396_v61 = vld [vmem:[%s2763_s29 + $0x298] sm:$0xff]  ;;  %v2110_v63 = vpack.c.bf16 %v402_v56, %v394_v55  ;;  %v393_v0 = vld [vmem:[%s2763_s29 + $0x280] sm:$0xff] }
  0x6a   : > { %2167 = vmatprep.subr.bf16.mxu1 %v2166_v45  ;;  %v404_v62 = vld [vmem:[%s2763_s29 + $0x2d8] sm:$0xff]  ;;  %v401_v1 = vld [vmem:[%s2763_s29 + $0x2c0] sm:$0xff]  ;;  %v2172_v2 = vpack.c.bf16 %v387_v59, %v379_v58  ;;  %v410_v3 = vld [vmem:[%s2763_s29 + $0x308] sm:$0xff] }
  0x6b   : > { %v418_v4 = vld [vmem:[%s2763_s29 + $0x348] sm:$0xff]  ;;  %v2174_v5 = vpack.c.bf16 %v404_v62, %v396_v61  ;;  %v395_v6 = vld [vmem:[%s2763_s29 + $0x290] sm:$0xff]  ;;  %v2112_v8 = vpack.c.bf16 %v401_v1, %v393_v0  ;;  %v412_v9 = vld [vmem:[%s2763_s29 + $0x318] sm:$0xff] }
  0x6c   : > { %2105 = vmatpush1.bf16.msra.mxu0 %v2104_v48  ;;  %v403_v7 = vld [vmem:[%s2763_s29 + $0x2d0] sm:$0xff]  ;;  %v420_v10 = vld [vmem:[%s2763_s29 + $0x358] sm:$0xff]  ;;  %v2114_v11 = vpack.c.bf16 %v418_v4, %v410_v3  ;;  %v409_v12 = vld [vmem:[%s2763_s29 + $0x300] sm:$0xff] }
  0x6d   : > { %2107 = vmatprep.subr.bf16.mxu0 %v2106_v51  ;;  %2169 = vmatpush1.bf16.msra.mxu1 %v2168_v54  ;;  %v417_v13 = vld [vmem:[%s2763_s29 + $0x340] sm:$0xff]  ;;  %v2176_v14 = vpack.c.bf16 %v403_v7, %v395_v6  ;;  %v426_v15 = vld [vmem:[%s2763_s29 + $0x388] sm:$0xff]  ;;  %v2178_v17 = vpack.c.bf16 %v420_v10, %v412_v9  ;;  %v411_v18 = vld [vmem:[%s2763_s29 + $0x310] sm:$0xff] }
  0x6e   : > { %2171 = vmatprep.subr.bf16.mxu1 %v2170_v57  ;;  %v434_v16 = vld [vmem:[%s2763_s29 + $0x3c8] sm:$0xff]  ;;  %v419_v19 = vld [vmem:[%s2763_s29 + $0x350] sm:$0xff]  ;;  %v2116_v20 = vpack.c.bf16 %v417_v13, %v409_v12  ;;  %v428_v21 = vld [vmem:[%s2763_s29 + $0x398] sm:$0xff] }
  0x6f   : > { %v436_v22 = vld [vmem:[%s2763_s29 + $0x3d8] sm:$0xff]  ;;  %v2118_v23 = vpack.c.bf16 %v434_v16, %v426_v15  ;;  %v425_v24 = vld [vmem:[%s2763_s29 + $0x380] sm:$0xff]  ;;  %v2180_v26 = vpack.c.bf16 %v419_v19, %v411_v18  ;;  %v442_v27 = vld [vmem:[%s2763_s29 + $0x408] sm:$0xff] }
  0x70   : > { %2109 = vmatpush1.bf16.msra.mxu0 %v2108_v60  ;;  %v433_v25 = vld [vmem:[%s2763_s29 + $0x3c0] sm:$0xff]  ;;  %v450_v28 = vld [vmem:[%s2763_s29 + $0x448] sm:$0xff]  ;;  %v2182_v29 = vpack.c.bf16 %v436_v22, %v428_v21  ;;  %v427_v30 = vld [vmem:[%s2763_s29 + $0x390] sm:$0xff] }
  0x71   : > { %2111 = vmatprep.subr.bf16.mxu0 %v2110_v63  ;;  %2173 = vmatpush1.bf16.msra.mxu1 %v2172_v2  ;;  %v435_v31 = vld [vmem:[%s2763_s29 + $0x3d0] sm:$0xff]  ;;  %v2120_v32 = vpack.c.bf16 %v433_v25, %v425_v24  ;;  %v444_v33 = vld [vmem:[%s2763_s29 + $0x418] sm:$0xff]  ;;  %v2122_v35 = vpack.c.bf16 %v450_v28, %v442_v27  ;;  %v441_v36 = vld [vmem:[%s2763_s29 + $0x400] sm:$0xff] }
  0x72   : > { %2175 = vmatprep.subr.bf16.mxu1 %v2174_v5  ;;  %v452_v34 = vld [vmem:[%s2763_s29 + $0x458] sm:$0xff]  ;;  %v449_v37 = vld [vmem:[%s2763_s29 + $0x440] sm:$0xff]  ;;  %v2184_v38 = vpack.c.bf16 %v435_v31, %v427_v30  ;;  %v458_v39 = vld [vmem:[%s2763_s29 + $0x488] sm:$0xff] }
  0x73   : > { %v466_v40 = vld [vmem:[%s2763_s29 + $0x4c8] sm:$0xff]  ;;  %v2186_v41 = vpack.c.bf16 %v452_v34, %v444_v33  ;;  %v443_v42 = vld [vmem:[%s2763_s29 + $0x410] sm:$0xff]  ;;  %v2124_v44 = vpack.c.bf16 %v449_v37, %v441_v36  ;;  %v460_v45 = vld [vmem:[%s2763_s29 + $0x498] sm:$0xff] }
  0x74   : > { %2113 = vmatpush1.bf16.msra.mxu0 %v2112_v8  ;;  %v451_v43 = vld [vmem:[%s2763_s29 + $0x450] sm:$0xff]  ;;  %v468_v46 = vld [vmem:[%s2763_s29 + $0x4d8] sm:$0xff]  ;;  %v2126_v47 = vpack.c.bf16 %v466_v40, %v458_v39  ;;  %v457_v48 = vld [vmem:[%s2763_s29 + $0x480] sm:$0xff] }
  0x75   : > { %2115 = vmatprep.subr.bf16.mxu0 %v2114_v11  ;;  %2177 = vmatpush1.bf16.msra.mxu1 %v2176_v14  ;;  %v465_v49 = vld [vmem:[%s2763_s29 + $0x4c0] sm:$0xff]  ;;  %v2188_v50 = vpack.c.bf16 %v451_v43, %v443_v42  ;;  %v474_v51 = vld [vmem:[%s2763_s29 + $0x508] sm:$0xff]  ;;  %v2190_v53 = vpack.c.bf16 %v468_v46, %v460_v45  ;;  %v459_v54 = vld [vmem:[%s2763_s29 + $0x490] sm:$0xff] }
  0x76   : > { %2179 = vmatprep.subr.bf16.mxu1 %v2178_v17  ;;  %v482_v52 = vld [vmem:[%s2763_s29 + $0x548] sm:$0xff]  ;;  %v467_v55 = vld [vmem:[%s2763_s29 + $0x4d0] sm:$0xff]  ;;  %v2128_v56 = vpack.c.bf16 %v465_v49, %v457_v48  ;;  %v476_v57 = vld [vmem:[%s2763_s29 + $0x518] sm:$0xff] }
  0x77   : > { %v484_v58 = vld [vmem:[%s2763_s29 + $0x558] sm:$0xff]  ;;  %v2130_v59 = vpack.c.bf16 %v482_v52, %v474_v51  ;;  %v473_v60 = vld [vmem:[%s2763_s29 + $0x500] sm:$0xff]  ;;  %v2192_v62 = vpack.c.bf16 %v467_v55, %v459_v54  ;;  %v490_v63 = vld [vmem:[%s2763_s29 + $0x588] sm:$0xff] }
  0x78   : > { %2117 = vmatpush1.bf16.msra.mxu0 %v2116_v20  ;;  %v481_v61 = vld [vmem:[%s2763_s29 + $0x540] sm:$0xff]  ;;  %v498_v0 = vld [vmem:[%s2763_s29 + $0x5c8] sm:$0xff]  ;;  %v2194_v1 = vpack.c.bf16 %v484_v58, %v476_v57  ;;  %v475_v2 = vld [vmem:[%s2763_s29 + $0x510] sm:$0xff] }
  0x79   : > { %2119 = vmatprep.subr.bf16.mxu0 %v2118_v23  ;;  %2181 = vmatpush1.bf16.msra.mxu1 %v2180_v26  ;;  %v483_v3 = vld [vmem:[%s2763_s29 + $0x550] sm:$0xff]  ;;  %v2132_v4 = vpack.c.bf16 %v481_v61, %v473_v60  ;;  %v492_v5 = vld [vmem:[%s2763_s29 + $0x598] sm:$0xff]  ;;  %v2134_v7 = vpack.c.bf16 %v498_v0, %v490_v63  ;;  %v489_v8 = vld [vmem:[%s2763_s29 + $0x580] sm:$0xff] }
  0x7a   : > { %2183 = vmatprep.subr.bf16.mxu1 %v2182_v29  ;;  %v500_v6 = vld [vmem:[%s2763_s29 + $0x5d8] sm:$0xff]  ;;  %v497_v9 = vld [vmem:[%s2763_s29 + $0x5c0] sm:$0xff]  ;;  %v2867_v10 = vld [vmem:[#allocation5 + $0x8] sm:$0xff]  ;;  %v2196_v11 = vpack.c.bf16 %v483_v3, %v475_v2 }
  0x7b   : > { %v506_v12 = vld [vmem:[%s2763_s29 + $0x608] sm:$0xff]  ;;  %665 = vmatprep.mubr.f32.mxu0 %v2867_v10  ;;  %v2198_v14 = vpack.c.bf16 %v500_v6, %v492_v5  ;;  %v491_v15 = vld [vmem:[%s2763_s29 + $0x590] sm:$0xff]  ;;  %826 = vmatprep.mubr.f32.mxu1 %v2867_v10  ;;  %v2136_v17 = vpack.c.bf16 %v497_v9, %v489_v8  ;;  %v508_v18 = vld [vmem:[%s2763_s29 + $0x618] sm:$0xff] }
  0x7c   : > { %2121 = vmatpush1.bf16.msra.mxu0 %v2120_v32  ;;  %v514_v13 = vld [vmem:[%s2763_s29 + $0x648] sm:$0xff]  ;;  %v499_v16 = vld [vmem:[%s2763_s29 + $0x5d0] sm:$0xff]  ;;  %v516_v19 = vld [vmem:[%s2763_s29 + $0x658] sm:$0xff] }
  0x7d   : > { %2123 = vmatprep.subr.bf16.mxu0 %v2122_v35  ;;  %2185 = vmatpush1.bf16.msra.mxu1 %v2184_v38  ;;  %v2138_v20 = vpack.c.bf16 %v514_v13, %v506_v12  ;;  %v505_v21 = vld [vmem:[%s2763_s29 + $0x600] sm:$0xff]  ;;  %v2200_v23 = vpack.c.bf16 %v499_v16, %v491_v15  ;;  %v522_v24 = vld [vmem:[%s2763_s29 + $0x688] sm:$0xff]  ;;  %v2202_v26 = vpack.c.bf16 %v516_v19, %v508_v18  ;;  %v507_v27 = vld [vmem:[%s2763_s29 + $0x610] sm:$0xff] }
  0x7e   : > { %2187 = vmatprep.subr.bf16.mxu1 %v2186_v41  ;;  %v513_v22 = vld [vmem:[%s2763_s29 + $0x640] sm:$0xff]  ;;  %v530_v25 = vld [vmem:[%s2763_s29 + $0x6c8] sm:$0xff]  ;;  %v515_v28 = vld [vmem:[%s2763_s29 + $0x650] sm:$0xff] }
  0x7f   : > { %v2140_v29 = vpack.c.bf16 %v513_v22, %v505_v21  ;;  %v524_v30 = vld [vmem:[%s2763_s29 + $0x698] sm:$0xff]  ;;  %v2142_v32 = vpack.c.bf16 %v530_v25, %v522_v24  ;;  %v521_v33 = vld [vmem:[%s2763_s29 + $0x680] sm:$0xff]  ;;  %v2204_v35 = vpack.c.bf16 %v515_v28, %v507_v27  ;;  %v538_v36 = vld [vmem:[%s2763_s29 + $0x708] sm:$0xff] }
  0x80   : > { %2125 = vmatpush1.bf16.msra.mxu0 %v2124_v44  ;;  %v532_v31 = vld [vmem:[%s2763_s29 + $0x6d8] sm:$0xff]  ;;  %v529_v34 = vld [vmem:[%s2763_s29 + $0x6c0] sm:$0xff]  ;;  %v546_v37 = vld [vmem:[%s2763_s29 + $0x748] sm:$0xff] }
  0x81   : > { %2127 = vmatprep.subr.bf16.mxu0 %v2126_v47  ;;  %2189 = vmatpush1.bf16.msra.mxu1 %v2188_v50  ;;  %v2206_v38 = vpack.c.bf16 %v532_v31, %v524_v30  ;;  %v523_v39 = vld [vmem:[%s2763_s29 + $0x690] sm:$0xff]  ;;  %v2144_v41 = vpack.c.bf16 %v529_v34, %v521_v33  ;;  %v540_v42 = vld [vmem:[%s2763_s29 + $0x718] sm:$0xff]  ;;  %v2146_v44 = vpack.c.bf16 %v546_v37, %v538_v36  ;;  %v537_v45 = vld [vmem:[%s2763_s29 + $0x700] sm:$0xff] }
  0x82   : > { %2191 = vmatprep.subr.bf16.mxu1 %v2190_v53  ;;  %v531_v40 = vld [vmem:[%s2763_s29 + $0x6d0] sm:$0xff]  ;;  %v548_v43 = vld [vmem:[%s2763_s29 + $0x758] sm:$0xff]  ;;  %v545_v46 = vld [vmem:[%s2763_s29 + $0x740] sm:$0xff] }
  0x83   : > { %v2208_v47 = vpack.c.bf16 %v531_v40, %v523_v39  ;;  %v554_v48 = vld [vmem:[%s2763_s29 + $0x788] sm:$0xff]  ;;  %v2210_v50 = vpack.c.bf16 %v548_v43, %v540_v42  ;;  %v539_v51 = vld [vmem:[%s2763_s29 + $0x710] sm:$0xff]  ;;  %v2148_v53 = vpack.c.bf16 %v545_v46, %v537_v45  ;;  %v556_v54 = vld [vmem:[%s2763_s29 + $0x798] sm:$0xff] }
  0x84   : > { %2129 = vmatpush1.bf16.msra.mxu0 %v2128_v56  ;;  %v562_v49 = vld [vmem:[%s2763_s29 + $0x7c8] sm:$0xff]  ;;  %v547_v52 = vld [vmem:[%s2763_s29 + $0x750] sm:$0xff]  ;;  %v564_v55 = vld [vmem:[%s2763_s29 + $0x7d8] sm:$0xff] }
  0x85   : > { %2131 = vmatprep.subr.bf16.mxu0 %v2130_v59  ;;  %2193 = vmatpush1.bf16.msra.mxu1 %v2192_v62  ;;  %v2150_v56 = vpack.c.bf16 %v562_v49, %v554_v48  ;;  %v553_v57 = vld [vmem:[%s2763_s29 + $0x780] sm:$0xff]  ;;  %v2212_v59 = vpack.c.bf16 %v547_v52, %v539_v51  ;;  %v318_v60 = vld [vmem:[%s2763_s29 + $0x28] sm:$0xff]  ;;  %v2214_v62 = vpack.c.bf16 %v564_v55, %v556_v54  ;;  %v555_v63 = vld [vmem:[%s2763_s29 + $0x790] sm:$0xff] }
  0x86   : > { %2195 = vmatprep.subr.bf16.mxu1 %v2194_v1  ;;  %v561_v58 = vld [vmem:[%s2763_s29 + $0x7c0] sm:$0xff]  ;;  %v326_v61 = vld [vmem:[%s2763_s29 + $0x68] sm:$0xff]  ;;  %v563_v0 = vld [vmem:[%s2763_s29 + $0x7d0] sm:$0xff] }
  0x87   : > { %v2152_v1 = vpack.c.bf16 %v561_v58, %v553_v57  ;;  %v320_v2 = vld [vmem:[%s2763_s29 + $0x38] sm:$0xff]  ;;  %v317_v5 = vld [vmem:[%s2763_s29 + $0x20] sm:$0xff]  ;;  %v334_v8 = vld [vmem:[%s2763_s29 + $0xa8] sm:$0xff] }
  0x88   : > { %2133 = vmatpush1.bf16.msra.mxu0 %v2132_v4  ;;  %v328_v3 = vld [vmem:[%s2763_s29 + $0x78] sm:$0xff]  ;;  %v2218_v4 = vpack.c.bf16 %v326_v61, %v318_v60  ;;  %v325_v6 = vld [vmem:[%s2763_s29 + $0x60] sm:$0xff]  ;;  %v342_v9 = vld [vmem:[%s2763_s29 + $0xe8] sm:$0xff] }
  0x89   : > { %2135 = vmatprep.subr.bf16.mxu0 %v2134_v7  ;;  %2197 = vmatpush1.bf16.msra.mxu1 %v2196_v11  ;;  %v2216_v7 = vpack.c.bf16 %v563_v0, %v555_v63  ;;  %v2282_v11 = vpack.c.bf16 %v328_v3, %v320_v2  ;;  %v319_v12 = vld [vmem:[%s2763_s29 + $0x30] sm:$0xff]  ;;  %v2220_v15 = vpack.c.bf16 %v325_v6, %v317_v5  ;;  %v336_v16 = vld [vmem:[%s2763_s29 + $0xb8] sm:$0xff]  ;;  %v341_v21 = vld [vmem:[%s2763_s29 + $0xe0] sm:$0xff] }
  0x8a   : > { %2199 = vmatprep.subr.bf16.mxu1 %v2198_v14  ;;  %v327_v13 = vld [vmem:[%s2763_s29 + $0x70] sm:$0xff]  ;;  %v2915_v14 = vld [vmem:[#allocation5] sm:$0xff]  ;;  %v2919_v18 = vld [vmem:[#allocation5 + $0x18] sm:$0xff]  ;;  %v2222_v19 = vpack.c.bf16 %v342_v9, %v334_v8 }
  0x8b   : > { %v2284_v22 = vpack.c.bf16 %v327_v13, %v319_v12  ;;  %v358_v24 = vld [vmem:[%s2763_s29 + $0x168] sm:$0xff]  ;;  %v343_v27 = vld [vmem:[%s2763_s29 + $0xf0] sm:$0xff]  ;;  %v352_v30 = vld [vmem:[%s2763_s29 + $0x138] sm:$0xff] }
  0x8c   : > { %2137 = vmatpush1.bf16.msra.mxu0 %v2136_v17  ;;  %v344_v17 = vld [vmem:[%s2763_s29 + $0xf8] sm:$0xff]  ;;  %v2929_v28 = vld [vmem:[#allocation5 + $0x10] sm:$0xff]  ;;  %v349_v34 = vld [vmem:[%s2763_s29 + $0x120] sm:$0xff] }
  0x8d   : > { %2139 = vmatprep.subr.bf16.mxu0 %v2138_v20  ;;  %2201 = vmatpush1.bf16.msra.mxu1 %v2200_v23  ;;  %v333_v20 = vld [vmem:[%s2763_s29 + $0xa0] sm:$0xff]  ;;  %v350_v23 = vld [vmem:[%s2763_s29 + $0x128] sm:$0xff]  ;;  %v2286_v25 = vpack.c.bf16 %v344_v17, %v336_v16  ;;  %v360_v31 = vld [vmem:[%s2763_s29 + $0x178] sm:$0xff] }
  0x8e   : > { %2203 = vmatprep.subr.bf16.mxu1 %v2202_v26  ;;  %v335_v26 = vld [vmem:[%s2763_s29 + $0xb0] sm:$0xff]  ;;  %v2226_v33 = vpack.c.bf16 %v358_v24, %v350_v23  ;;  %v366_v37 = vld [vmem:[%s2763_s29 + $0x1a8] sm:$0xff]  ;;  %v2290_v39 = vpack.c.bf16 %v360_v31, %v352_v30  ;;  %v2945_v42 = vld [vmem:[#allocation5 + $0x20] sm:$0xff] }
  0x8f   : > { %v2288_v36 = vpack.c.bf16 %v343_v27, %v335_v26  ;;  %v351_v40 = vld [vmem:[%s2763_s29 + $0x130] sm:$0xff]  ;;  %v376_v45 = vld [vmem:[%s2763_s29 + $0x1f8] sm:$0xff]  ;;  %v365_v48 = vld [vmem:[%s2763_s29 + $0x1a0] sm:$0xff] }
  0x90   : > { %2141 = vmatpush1.bf16.msra.mxu0 %v2140_v29  ;;  %v2224_v29 = vpack.c.bf16 %v341_v21, %v333_v20  ;;  %v2950_v46 = vld [vmem:[#allocation5 + $0x38] sm:$0xff]  ;;  %v373_v49 = vld [vmem:[%s2763_s29 + $0x1e0] sm:$0xff]  ;;  %v382_v51 = vld [vmem:[%s2763_s29 + $0x228] sm:$0xff] }
  0x91   : > { %2143 = vmatprep.subr.bf16.mxu0 %v2142_v32  ;;  %2205 = vmatpush1.bf16.msra.mxu1 %v2204_v35  ;;  %v2934_v32 = vld [vmem:[#allocation5 + $0x28] sm:$0xff]  ;;  %v357_v35 = vld [vmem:[%s2763_s29 + $0x160] sm:$0xff]  ;;  %v367_v54 = vld [vmem:[%s2763_s29 + $0x1b0] sm:$0xff]  ;;  %v2232_v57 = vpack.c.bf16 %v373_v49, %v365_v48 }
  0x92   : > { %2207 = vmatprep.subr.bf16.mxu1 %v2206_v38  ;;  %v374_v38 = vld [vmem:[%s2763_s29 + $0x1e8] sm:$0xff]  ;;  %v2228_v43 = vpack.c.bf16 %v357_v35, %v349_v34  ;;  %v375_v55 = vld [vmem:[%s2763_s29 + $0x1f0] sm:$0xff]  ;;  %v384_v58 = vld [vmem:[%s2763_s29 + $0x238] sm:$0xff] }
  0x93   : > { %v390_v52 = vld [vmem:[%s2763_s29 + $0x268] sm:$0xff]  ;;  %v389_v63 = vld [vmem:[%s2763_s29 + $0x260] sm:$0xff]  ;;  %v2296_v0 = vpack.c.bf16 %v375_v55, %v367_v54  ;;  %v391_v5 = vld [vmem:[%s2763_s29 + $0x270] sm:$0xff] }
  0x94   : > { %2145 = vmatpush1.bf16.msra.mxu0 %v2144_v41  ;;  %v359_v41 = vld [vmem:[%s2763_s29 + $0x170] sm:$0xff]  ;;  %v2966_v60 = vld [vmem:[#allocation5 + $0x48] sm:$0xff]  ;;  %v2234_v61 = vpack.c.bf16 %v390_v52, %v382_v51  ;;  %v2977_v6 = vld [vmem:[#allocation5 + $0x40] sm:$0xff] }
  0x95   : > { %2147 = vmatprep.subr.bf16.mxu0 %v2146_v44  ;;  %2209 = vmatpush1.bf16.msra.mxu1 %v2208_v47  ;;  %v368_v44 = vld [vmem:[%s2763_s29 + $0x1b8] sm:$0xff]  ;;  %v2230_v47 = vpack.c.bf16 %v374_v38, %v366_v37  ;;  %v406_v2 = vld [vmem:[%s2763_s29 + $0x2e8] sm:$0xff]  ;;  %v397_v13 = vld [vmem:[%s2763_s29 + $0x2a0] sm:$0xff] }
  0x96   : > { %2211 = vmatprep.subr.bf16.mxu1 %v2210_v50  ;;  %v2292_v50 = vpack.c.bf16 %v359_v41, %v351_v40  ;;  %v400_v8 = vld [vmem:[%s2763_s29 + $0x2b8] sm:$0xff]  ;;  %v414_v17 = vld [vmem:[%s2763_s29 + $0x328] sm:$0xff]  ;;  %v399_v21 = vld [vmem:[%s2763_s29 + $0x2b0] sm:$0xff] }
  0x97   : > { %v408_v9 = vld [vmem:[%s2763_s29 + $0x2f8] sm:$0xff]  ;;  %v2993_v23 = vld [vmem:[#allocation5 + $0x50] sm:$0xff]  ;;  %v2998_v27 = vld [vmem:[#allocation5 + $0x68] sm:$0xff] }
  0x98   : > { %2149 = vmatpush1.bf16.msra.mxu0 %v2148_v53  ;;  %v2294_v53 = vpack.c.bf16 %v376_v45, %v368_v44  ;;  %v2302_v20 = vpack.c.bf16 %v408_v9, %v400_v8  ;;  %v424_v26 = vld [vmem:[%s2763_s29 + $0x378] sm:$0xff]  ;;  %v413_v30 = vld [vmem:[%s2763_s29 + $0x320] sm:$0xff]  ;;  %v430_v34 = vld [vmem:[%s2763_s29 + $0x3a8] sm:$0xff] }
  0x99   : > { %2151 = vmatprep.subr.bf16.mxu0 %v2150_v56  ;;  %2213 = vmatpush1.bf16.msra.mxu1 %v2212_v59  ;;  %v2961_v56 = vld [vmem:[#allocation5 + $0x30] sm:$0xff]  ;;  %v392_v59 = vld [vmem:[%s2763_s29 + $0x278] sm:$0xff]  ;;  %v421_v31 = vld [vmem:[%s2763_s29 + $0x360] sm:$0xff] }
  0x9a   : > { %2215 = vmatprep.subr.bf16.mxu1 %v2214_v62  ;;  %v381_v62 = vld [vmem:[%s2763_s29 + $0x220] sm:$0xff]  ;;  %v2298_v3 = vpack.c.bf16 %v392_v59, %v384_v58  ;;  %v438_v35 = vld [vmem:[%s2763_s29 + $0x3e8] sm:$0xff]  ;;  %v415_v37 = vld [vmem:[%s2763_s29 + $0x330] sm:$0xff]  ;;  %v2244_v40 = vpack.c.bf16 %v421_v31, %v413_v30 }
  0x9b   : > { %v423_v38 = vld [vmem:[%s2763_s29 + $0x370] sm:$0xff]  ;;  %v432_v41 = vld [vmem:[%s2763_s29 + $0x3b8] sm:$0xff]  ;;  %v2246_v45 = vpack.c.bf16 %v438_v35, %v430_v34  ;;  %v437_v48 = vld [vmem:[%s2763_s29 + $0x3e0] sm:$0xff] }
  0x9c   : > { %2153 = vmatpush1.bf16.msra.mxu0 %v2152_v1  ;;  %v398_v1 = vld [vmem:[%s2763_s29 + $0x2a8] sm:$0xff]  ;;  %v3014_v44 = vld [vmem:[#allocation5 + $0x78] sm:$0xff]  ;;  %v2308_v49 = vpack.c.bf16 %v423_v38, %v415_v37  ;;  %v439_v54 = vld [vmem:[%s2763_s29 + $0x3f0] sm:$0xff] }
  0x9d   : > { %2219 = vmatprep.subr.bf16.mxu0 %v2218_v4  ;;  %2217 = vmatpush1.bf16.msra.mxu1 %v2216_v7  ;;  %v383_v4 = vld [vmem:[%s2763_s29 + $0x230] sm:$0xff]  ;;  %v2236_v7 = vpack.c.bf16 %v389_v63, %v381_v62  ;;  %v2238_v12 = vpack.c.bf16 %v406_v2, %v398_v1  ;;  %v454_v51 = vld [vmem:[%s2763_s29 + $0x468] sm:$0xff]  ;;  %v448_v58 = vld [vmem:[%s2763_s29 + $0x438] sm:$0xff] }
  0x9e   : > { %2283 = vmatprep.subr.bf16.mxu1 %v2282_v11  ;;  %v2982_v11 = vld [vmem:[#allocation5 + $0x58] sm:$0xff]  ;;  %v2300_v16 = vpack.c.bf16 %v391_v5, %v383_v4  ;;  %v3025_v55 = vld [vmem:[#allocation5 + $0x70] sm:$0xff]  ;;  %v445_v63 = vld [vmem:[%s2763_s29 + $0x420] sm:$0xff] }
  0x9f   : > { %666 = vmatmul.mubr.f32.vlgmr.msra.gmra.mrb[0].mxu0 %v2915_v14  ;;  %v456_v59 = vld [vmem:[%s2763_s29 + $0x478] sm:$0xff]  ;;  %v462_v2 = vld [vmem:[%s2763_s29 + $0x4a8] sm:$0xff]  ;;  %v447_v5 = vld [vmem:[%s2763_s29 + $0x430] sm:$0xff] }
  0xa0   : > { %2221 = vmatpush1.bf16.msra.mxu0 %v2220_v15  ;;  %671 = vmatprep.mubr.f32.mxu0 %v2919_v18  ;;  %v405_v15 = vld [vmem:[%s2763_s29 + $0x2e0] sm:$0xff]  ;;  %v2314_v4 = vpack.c.bf16 %v456_v59, %v448_v58  ;;  %v480_v31 = vld [vmem:[%s2763_s29 + $0x538] sm:$0xff]  ;;  %v3062_v34 = vld [vmem:[#allocation5 + $0xa8] sm:$0xff] }
  0xa1   : > { %827 = vmatmul.mubr.f32.vlgmr.msra.gmra.mrb[0].mxu1 %v2915_v14  ;;  %2223 = vmatprep.subr.bf16.mxu0 %v2222_v19  ;;  %v422_v19 = vld [vmem:[%s2763_s29 + $0x368] sm:$0xff]  ;;  %v2240_v24 = vpack.c.bf16 %v405_v15, %v397_v13  ;;  %v3041_v8 = vld [vmem:[#allocation5 + $0x80] sm:$0xff]  ;;  %v472_v13 = vld [vmem:[%s2763_s29 + $0x4f8] sm:$0xff] }
  0xa2   : > { %2285 = vmatpush1.bf16.msra.mxu1 %v2284_v22  ;;  %832 = vmatprep.mubr.f32.mxu1 %v2919_v18  ;;  %v407_v22 = vld [vmem:[%s2763_s29 + $0x2f0] sm:$0xff]  ;;  %v3046_v15 = vld [vmem:[#allocation5 + $0x98] sm:$0xff]  ;;  %v485_v37 = vld [vmem:[%s2763_s29 + $0x560] sm:$0xff] }
  0xa3   : > { %672 = vmatmul.mubr.f32.gmra.mrb[2].mxu0 %v2929_v28  ;;  %2287 = vmatprep.subr.bf16.mxu1 %v2286_v25  ;;  %v416_v25 = vld [vmem:[%s2763_s29 + $0x338] sm:$0xff]  ;;  %v510_v59 = vld [vmem:[%s2763_s29 + $0x628] sm:$0xff] }
  0xa4   : > { %2225 = vmatpush1.bf16.msra.mxu0 %v2224_v29  ;;  %677 = vmatprep.mubr.f32.mxu0 %v2934_v32  ;;  %v2242_v29 = vpack.c.bf16 %v422_v19, %v414_v17  ;;  %v461_v17 = vld [vmem:[%s2763_s29 + $0x4a0] sm:$0xff] }
  0xa5   : > { %833 = vmatmul.mubr.f32.gmra.mrb[2].mxu1 %v2929_v28  ;;  %2227 = vmatprep.subr.bf16.mxu0 %v2226_v33  ;;  %v2304_v33 = vpack.c.bf16 %v407_v22, %v399_v21  ;;  %v469_v19 = vld [vmem:[%s2763_s29 + $0x4e0] sm:$0xff]  ;;  %v478_v21 = vld [vmem:[%s2763_s29 + $0x528] sm:$0xff] }
  0xa6   : > { %2289 = vmatpush1.bf16.msra.mxu1 %v2288_v36  ;;  %838 = vmatprep.mubr.f32.mxu1 %v2934_v32  ;;  %v2306_v36 = vpack.c.bf16 %v424_v26, %v416_v25  ;;  %v486_v22 = vld [vmem:[%s2763_s29 + $0x568] sm:$0xff]  ;;  %v463_v25 = vld [vmem:[%s2763_s29 + $0x4b0] sm:$0xff]  ;;  %v2256_v30 = vpack.c.bf16 %v469_v19, %v461_v17 }
  0xa7   : > { %678 = vmatmul.mubr.f32.gmra.mrb[4].mxu0 %v2945_v42  ;;  %2291 = vmatprep.subr.bf16.mxu1 %v2290_v39  ;;  %v3009_v39 = vld [vmem:[#allocation5 + $0x60] sm:$0xff]  ;;  %v471_v26 = vld [vmem:[%s2763_s29 + $0x4f0] sm:$0xff]  ;;  %v2258_v35 = vpack.c.bf16 %v486_v22, %v478_v21  ;;  %v526_v17 = vld [vmem:[%s2763_s29 + $0x6a8] sm:$0xff] }
  0xa8   : > { %2229 = vmatpush1.bf16.msra.mxu0 %v2228_v43  ;;  %683 = vmatprep.mubr.f32.mxu0 %v2950_v46  ;;  %v440_v43 = vld [vmem:[%s2763_s29 + $0x3f8] sm:$0xff]  ;;  %v2320_v38 = vpack.c.bf16 %v471_v26, %v463_v25  ;;  %v534_v19 = vld [vmem:[%s2763_s29 + $0x6e8] sm:$0xff]  ;;  %v511_v21 = vld [vmem:[%s2763_s29 + $0x630] sm:$0xff] }
  0xa9   : > { %839 = vmatmul.mubr.f32.gmra.mrb[4].mxu1 %v2945_v42  ;;  %2231 = vmatprep.subr.bf16.mxu0 %v2230_v47  ;;  %v429_v47 = vld [vmem:[%s2763_s29 + $0x3a0] sm:$0xff]  ;;  %v2310_v52 = vpack.c.bf16 %v440_v43, %v432_v41  ;;  %v502_v41 = vld [vmem:[%s2763_s29 + $0x5e8] sm:$0xff]  ;;  %v519_v22 = vld [vmem:[%s2763_s29 + $0x670] sm:$0xff] }
  0xaa   : > { %2293 = vmatpush1.bf16.msra.mxu1 %v2292_v50  ;;  %844 = vmatprep.mubr.f32.mxu1 %v2950_v46  ;;  %v446_v50 = vld [vmem:[%s2763_s29 + $0x428] sm:$0xff]  ;;  %v528_v26 = vld [vmem:[%s2763_s29 + $0x6b8] sm:$0xff] }
  0xab   : > { %684 = vmatmul.mubr.f32.gmra.mrb[6].mxu0 %v2961_v56  ;;  %2295 = vmatprep.subr.bf16.mxu1 %v2294_v53  ;;  %v431_v53 = vld [vmem:[%s2763_s29 + $0x3b0] sm:$0xff]  ;;  %v2250_v62 = vpack.c.bf16 %v454_v51, %v446_v50  ;;  %v496_v50 = vld [vmem:[%s2763_s29 + $0x5b8] sm:$0xff] }
  0xac   : > { %2233 = vmatpush1.bf16.msra.mxu0 %v2232_v57  ;;  %689 = vmatprep.mubr.f32.mxu0 %v2966_v60  ;;  %v2248_v57 = vpack.c.bf16 %v437_v48, %v429_v47  ;;  %v2312_v1 = vpack.c.bf16 %v439_v54, %v431_v53  ;;  %v487_v47 = vld [vmem:[%s2763_s29 + $0x570] sm:$0xff]  ;;  %v3073_v48 = vld [vmem:[#allocation5 + $0xa0] sm:$0xff]  ;;  %v504_v51 = vld [vmem:[%s2763_s29 + $0x5f8] sm:$0xff] }
  0xad   : > { %845 = vmatmul.mubr.f32.gmra.mrb[6].mxu1 %v2961_v56  ;;  %2235 = vmatprep.subr.bf16.mxu0 %v2234_v61  ;;  %v3030_v61 = vld [vmem:[#allocation5 + $0x88] sm:$0xff]  ;;  %v493_v54 = vld [vmem:[%s2763_s29 + $0x5a0] sm:$0xff] }
  0xae   : > { %2297 = vmatpush1.bf16.msra.mxu1 %v2296_v0  ;;  %850 = vmatprep.mubr.f32.mxu1 %v2966_v60  ;;  %v453_v0 = vld [vmem:[%s2763_s29 + $0x460] sm:$0xff] }
  0xaf   : > { %690 = vmatmul.mubr.f32.gmra.mrb[8].mxu0 %v2977_v6  ;;  %2299 = vmatprep.subr.bf16.mxu1 %v2298_v3  ;;  %v470_v3 = vld [vmem:[%s2763_s29 + $0x4e8] sm:$0xff]  ;;  %v2252_v9 = vpack.c.bf16 %v453_v0, %v445_v63  ;;  %v2326_v63 = vpack.c.bf16 %v504_v51, %v496_v50  ;;  %v495_v0 = vld [vmem:[%s2763_s29 + $0x5b0] sm:$0xff]  ;;  %v544_v50 = vld [vmem:[%s2763_s29 + $0x738] sm:$0xff] }
  0xb0   : > { %2237 = vmatpush1.bf16.msra.mxu0 %v2236_v7  ;;  %695 = vmatprep.mubr.f32.mxu0 %v2982_v11  ;;  %v455_v7 = vld [vmem:[%s2763_s29 + $0x470] sm:$0xff]  ;;  %v552_v51 = vld [vmem:[%s2763_s29 + $0x778] sm:$0xff] }
  0xb1   : > { %851 = vmatmul.mubr.f32.gmra.mrb[8].mxu1 %v2977_v6  ;;  %2239 = vmatprep.subr.bf16.mxu0 %v2238_v12  ;;  %v464_v12 = vld [vmem:[%s2763_s29 + $0x4b8] sm:$0xff] }
  0xb2   : > { %2301 = vmatpush1.bf16.msra.mxu1 %v2300_v16  ;;  %856 = vmatprep.mubr.f32.mxu1 %v2982_v11  ;;  %v2254_v16 = vpack.c.bf16 %v470_v3, %v462_v2  ;;  %v3089_v2 = vld [vmem:[#allocation5 + $0xb0] sm:$0xff] }
  0xb3   : > { %696 = vmatmul.mubr.f32.gmra.mrb[10].mxu0 %v2993_v23  ;;  %2303 = vmatprep.subr.bf16.mxu1 %v2302_v20  ;;  %v2316_v20 = vpack.c.bf16 %v455_v7, %v447_v5  ;;  %v520_v5 = vld [vmem:[%s2763_s29 + $0x678] sm:$0xff]  ;;  %v3094_v7 = vld [vmem:[#allocation5 + $0xc8] sm:$0xff] }
  0xb4   : > { %2241 = vmatpush1.bf16.msra.mxu0 %v2240_v24  ;;  %701 = vmatprep.mubr.f32.mxu0 %v2998_v27  ;;  %v2318_v24 = vpack.c.bf16 %v472_v13, %v464_v12  ;;  %v509_v12 = vld [vmem:[%s2763_s29 + $0x620] sm:$0xff] }
  0xb5   : > { %857 = vmatmul.mubr.f32.gmra.mrb[10].mxu1 %v2993_v23  ;;  %2243 = vmatprep.subr.bf16.mxu0 %v2242_v29  ;;  %v3057_v29 = vld [vmem:[#allocation5 + $0x90] sm:$0xff]  ;;  %v517_v13 = vld [vmem:[%s2763_s29 + $0x660] sm:$0xff] }
  0xb6   : > { %2305 = vmatpush1.bf16.msra.mxu1 %v2304_v33  ;;  %862 = vmatprep.mubr.f32.mxu1 %v2998_v27  ;;  %v488_v33 = vld [vmem:[%s2763_s29 + $0x578] sm:$0xff]  ;;  %v2268_v25 = vpack.c.bf16 %v517_v13, %v509_v12 }
  0xb7   : > { %702 = vmatmul.mubr.f32.gmra.mrb[12].mxu0 %v3009_v39  ;;  %2307 = vmatprep.subr.bf16.mxu1 %v2306_v36  ;;  %v477_v36 = vld [vmem:[%s2763_s29 + $0x520] sm:$0xff]  ;;  %v2322_v43 = vpack.c.bf16 %v488_v33, %v480_v31  ;;  %v3110_v31 = vld [vmem:[#allocation5 + $0xd8] sm:$0xff]  ;;  %v2270_v33 = vpack.c.bf16 %v534_v19, %v526_v17 }
  0xb8   : > { %2245 = vmatpush1.bf16.msra.mxu0 %v2244_v40  ;;  %707 = vmatprep.mubr.f32.mxu0 %v3014_v44  ;;  %v494_v40 = vld [vmem:[%s2763_s29 + $0x5a8] sm:$0xff]  ;;  %v568_v12 = vld [vmem:[%s2763_s29 + $0x7f8] sm:$0xff]  ;;  %v557_v17 = vld [vmem:[%s2763_s29 + $0x7a0] sm:$0xff] }
  0xb9   : > { %863 = vmatmul.mubr.f32.gmra.mrb[12].mxu1 %v3009_v39  ;;  %2247 = vmatprep.subr.bf16.mxu0 %v2246_v45  ;;  %v479_v45 = vld [vmem:[%s2763_s29 + $0x530] sm:$0xff]  ;;  %v2262_v53 = vpack.c.bf16 %v502_v41, %v494_v40  ;;  %v550_v40 = vld [vmem:[%s2763_s29 + $0x768] sm:$0xff]  ;;  %v3142_v13 = vld [vmem:[#allocation5 + $0xf8] sm:$0xff] }
  0xba   : > { %2309 = vmatpush1.bf16.msra.mxu1 %v2308_v49  ;;  %868 = vmatprep.mubr.f32.mxu1 %v3014_v44  ;;  %v2260_v49 = vpack.c.bf16 %v485_v37, %v477_v36  ;;  %v2324_v58 = vpack.c.bf16 %v487_v47, %v479_v45  ;;  %v533_v36 = vld [vmem:[%s2763_s29 + $0x6e0] sm:$0xff]  ;;  %v2332_v37 = vpack.c.bf16 %v519_v22, %v511_v21  ;;  %v535_v45 = vld [vmem:[%s2763_s29 + $0x6f0] sm:$0xff] }
  0xbb   : > { %708 = vmatmul.mubr.f32.gmra.mrb[14].mxu0 %v3025_v55  ;;  %2311 = vmatprep.subr.bf16.mxu1 %v2310_v52  ;;  %v3078_v52 = vld [vmem:[#allocation5 + $0xb8] sm:$0xff]  ;;  %v3121_v47 = vld [vmem:[#allocation5 + $0xd0] sm:$0xff]  ;;  %v565_v19 = vld [vmem:[%s2763_s29 + $0x7e0] sm:$0xff] }
  0xbc   : > { %2249 = vmatpush1.bf16.msra.mxu0 %v2248_v57  ;;  %713 = vmatprep.mubr.f32.mxu0 %v3030_v61  ;;  %v501_v57 = vld [vmem:[%s2763_s29 + $0x5e0] sm:$0xff]  ;;  %v559_v22 = vld [vmem:[%s2763_s29 + $0x7b0] sm:$0xff] }
  0xbd   : > { %869 = vmatmul.mubr.f32.gmra.mrb[14].mxu1 %v3025_v55  ;;  %2251 = vmatprep.subr.bf16.mxu0 %v2250_v62  ;;  %v518_v62 = vld [vmem:[%s2763_s29 + $0x668] sm:$0xff]  ;;  %v2264_v3 = vpack.c.bf16 %v501_v57, %v493_v54  ;;  %v541_v57 = vld [vmem:[%s2763_s29 + $0x720] sm:$0xff] }
  0xbe   : > { %2313 = vmatpush1.bf16.msra.mxu1 %v2312_v1  ;;  %874 = vmatprep.mubr.f32.mxu1 %v3030_v61  ;;  %v503_v1 = vld [vmem:[%s2763_s29 + $0x5f0] sm:$0xff] }
  0xbf   : > { %714 = vmatmul.mubr.f32.gmra.mrb[16].mxu0 %v3041_v8  ;;  %2315 = vmatprep.subr.bf16.mxu1 %v2314_v4  ;;  %v512_v4 = vld [vmem:[%s2763_s29 + $0x638] sm:$0xff] }
  0xc0   : > { %2253 = vmatpush1.bf16.msra.mxu0 %v2252_v9  ;;  %719 = vmatprep.mubr.f32.mxu0 %v3046_v15  ;;  %v2266_v9 = vpack.c.bf16 %v518_v62, %v510_v59  ;;  %v558_v62 = vld [vmem:[%s2763_s29 + $0x7a8] sm:$0xff] }
  0xc1   : > { %875 = vmatmul.mubr.f32.gmra.mrb[16].mxu1 %v3041_v8  ;;  %2255 = vmatprep.subr.bf16.mxu0 %v2254_v16  ;;  %v2328_v16 = vpack.c.bf16 %v503_v1, %v495_v0  ;;  %v2338_v0 = vpack.c.bf16 %v552_v51, %v544_v50  ;;  %v543_v1 = vld [vmem:[%s2763_s29 + $0x730] sm:$0xff] }
  0xc2   : > { %2317 = vmatpush1.bf16.msra.mxu1 %v2316_v20  ;;  %880 = vmatprep.mubr.f32.mxu1 %v3046_v15  ;;  %v2330_v20 = vpack.c.bf16 %v520_v5, %v512_v4  ;;  %v3137_v4 = vld [vmem:[#allocation5 + $0xe0] sm:$0xff] }
  0xc3   : > { %720 = vmatmul.mubr.f32.gmra.mrb[18].mxu0 %v3057_v29  ;;  %2319 = vmatprep.subr.bf16.mxu1 %v2318_v24  ;;  %v3105_v24 = vld [vmem:[#allocation5 + $0xc0] sm:$0xff] }
  0xc4   : > { %2257 = vmatpush1.bf16.msra.mxu0 %v2256_v30  ;;  %725 = vmatprep.mubr.f32.mxu0 %v3062_v34  ;;  %v536_v30 = vld [vmem:[%s2763_s29 + $0x6f8] sm:$0xff] }
  0xc5   : > { %881 = vmatmul.mubr.f32.gmra.mrb[18].mxu1 %v3057_v29  ;;  %2259 = vmatprep.subr.bf16.mxu0 %v2258_v35  ;;  %v525_v35 = vld [vmem:[%s2763_s29 + $0x6a0] sm:$0xff]  ;;  %v2334_v41 = vpack.c.bf16 %v536_v30, %v528_v26  ;;  %v3151_v26 = vld [vmem:[#allocation5 + $0xf0] sm:$0xff]  ;;  %v2280_v30 = vpack.c.bf16 %v565_v19, %v557_v17  ;;  %v2578_v19 = vmov 0.0  }
  0xc6   : > { %2321 = vmatpush1.bf16.msra.mxu1 %v2320_v38  ;;  %886 = vmatprep.mubr.f32.mxu1 %v3062_v34  ;;  %v542_v38 = vld [vmem:[%s2763_s29 + $0x728] sm:$0xff]  ;;  %281 = vst.msk [vmem:[%s3262_s28] sm:$0xff] %vm280_vm0, %v2578_v19  ;;  %282 = vst.msk [vmem:[%s3262_s28 + $0x8] sm:$0xff] %vm280_vm0, %v2578_v19 }
  0xc7   : > { %726 = vmatmul.mubr.f32.gmra.mrb[20].mxu0 %v3073_v48  ;;  %2323 = vmatprep.subr.bf16.mxu1 %v2322_v43  ;;  %v527_v43 = vld [vmem:[%s2763_s29 + $0x6b0] sm:$0xff]  ;;  %v2274_v54 = vpack.c.bf16 %v550_v40, %v542_v38  ;;  %283 = vst.msk [vmem:[%s3262_s28 + $0x10] sm:$0xff] %vm280_vm0, %v2578_v19  ;;  %284 = vst.msk [vmem:[%s3262_s28 + $0x18] sm:$0xff] %vm280_vm0, %v2578_v19 }
  0xc8   : > { %2261 = vmatpush1.bf16.msra.mxu0 %v2260_v49  ;;  %731 = vmatprep.mubr.f32.mxu0 %v3078_v52  ;;  %v2272_v49 = vpack.c.bf16 %v533_v36, %v525_v35  ;;  %v2336_v59 = vpack.c.bf16 %v535_v45, %v527_v43  ;;  %285 = vst.msk [vmem:[%s3262_s28 + $0x20] sm:$0xff] %vm280_vm0, %v2578_v19  ;;  %286 = vst.msk [vmem:[%s3262_s28 + $0x28] sm:$0xff] %vm280_vm0, %v2578_v19 }
  0xc9   : > { %887 = vmatmul.mubr.f32.gmra.mrb[20].mxu1 %v3073_v48  ;;  %2263 = vmatprep.subr.bf16.mxu0 %v2262_v53  ;;  %v3126_v53 = vld [vmem:[#allocation5 + $0xe8] sm:$0xff]  ;;  %287 = vst.msk [vmem:[%s3262_s28 + $0x30] sm:$0xff] %vm280_vm0, %v2578_v19  ;;  %288 = vst.msk [vmem:[%s3262_s28 + $0x38] sm:$0xff] %vm280_vm0, %v2578_v19 }
  0xca   : > { %2325 = vmatpush1.bf16.msra.mxu1 %v2324_v58  ;;  %892 = vmatprep.mubr.f32.mxu1 %v3078_v52  ;;  %v549_v58 = vld [vmem:[%s2763_s29 + $0x760] sm:$0xff]  ;;  %289 = vst.msk [vmem:[%s3262_s28 + $0x40] sm:$0xff] %vm280_vm0, %v2578_v19  ;;  %290 = vst.msk [vmem:[%s3262_s28 + $0x48] sm:$0xff] %vm280_vm0, %v2578_v19 }
  0xcb   : > { %732 = vmatmul.mubr.f32.gmra.mrb[22].mxu0 %v3089_v2  ;;  %2327 = vmatprep.subr.bf16.mxu1 %v2326_v63  ;;  %v566_v63 = vld [vmem:[%s2763_s29 + $0x7e8] sm:$0xff]  ;;  %v2276_v5 = vpack.c.bf16 %v549_v58, %v541_v57  ;;  %291 = vst.msk [vmem:[%s3262_s28 + $0x50] sm:$0xff] %vm280_vm0, %v2578_v19  ;;  %292 = vst.msk [vmem:[%s3262_s28 + $0x58] sm:$0xff] %vm280_vm0, %v2578_v19 }
  0xcc   : > { %2265 = vmatpush1.bf16.msra.mxu0 %v2264_v3  ;;  %737 = vmatprep.mubr.f32.mxu0 %v3094_v7  ;;  %v551_v3 = vld [vmem:[%s2763_s29 + $0x770] sm:$0xff]  ;;  %293 = vst.msk [vmem:[%s3262_s28 + $0x60] sm:$0xff] %vm280_vm0, %v2578_v19  ;;  %294 = vst.msk [vmem:[%s3262_s28 + $0x68] sm:$0xff] %vm280_vm0, %v2578_v19 }
  0xcd   : > { %893 = vmatmul.mubr.f32.gmra.mrb[22].mxu1 %v3089_v2  ;;  %2267 = vmatprep.subr.bf16.mxu0 %v2266_v9  ;;  %v560_v9 = vld [vmem:[%s2763_s29 + $0x7b8] sm:$0xff]  ;;  %295 = vst.msk [vmem:[%s3262_s28 + $0x70] sm:$0xff] %vm280_vm0, %v2578_v19  ;;  %296 = vst.msk [vmem:[%s3262_s28 + $0x78] sm:$0xff] %vm280_vm0, %v2578_v19 }
  0xce   : > { %2329 = vmatpush1.bf16.msra.mxu1 %v2328_v16  ;;  %898 = vmatprep.mubr.f32.mxu1 %v3094_v7  ;;  %v2278_v16 = vpack.c.bf16 %v566_v63, %v558_v62  ;;  %v2342_v21 = vpack.c.bf16 %v568_v12, %v560_v9  ;;  %297 = vst.msk [vmem:[%s3446_s30] sm:$0xff] %vm280_vm0, %v2578_v19  ;;  %298 = vst.msk [vmem:[%s3446_s30 + $0x8] sm:$0xff] %vm280_vm0, %v2578_v19 }
  0xcf   : > { %738 = vmatmul.mubr.f32.gmra.mrb[24].mxu0 %v3105_v24  ;;  %2331 = vmatprep.subr.bf16.mxu1 %v2330_v20  ;;  %v2340_v20 = vpack.c.bf16 %v551_v3, %v543_v1  ;;  %299 = vst.msk [vmem:[%s3446_s30 + $0x10] sm:$0xff] %vm280_vm0, %v2578_v19  ;;  %300 = vst.msk [vmem:[%s3446_s30 + $0x18] sm:$0xff] %vm280_vm0, %v2578_v19 }
  0xd0   : > { %2269 = vmatpush1.bf16.msra.mxu0 %v2268_v25  ;;  %743 = vmatprep.mubr.f32.mxu0 %v3110_v31  ;;  %v567_v25 = vld [vmem:[%s2763_s29 + $0x7f0] sm:$0xff]  ;;  %301 = vst.msk [vmem:[%s3446_s30 + $0x20] sm:$0xff] %vm280_vm0, %v2578_v19  ;;  %302 = vst.msk [vmem:[%s3446_s30 + $0x28] sm:$0xff] %vm280_vm0, %v2578_v19  ;;  %s3568_s29 = scalar_lea.hbm %s3717_s2, %s2089_s6 }
  0xd1   : > { %899 = vmatmul.mubr.f32.gmra.mrb[24].mxu1 %v3105_v24  ;;  %2271 = vmatprep.subr.bf16.mxu0 %v2270_v33  ;;  %v2344_v33 = vpack.c.bf16 %v567_v25, %v559_v22  ;;  %303 = vst.msk [vmem:[%s3446_s30 + $0x30] sm:$0xff] %vm280_vm0, %v2578_v19  ;;  %304 = vst.msk [vmem:[%s3446_s30 + $0x38] sm:$0xff] %vm280_vm0, %v2578_v19 }
  0xd2   : > { %2333 = vmatpush1.bf16.msra.mxu1 %v2332_v37  ;;  %904 = vmatprep.mubr.f32.mxu1 %v3110_v31  ;;  %305 = vst.msk [vmem:[%s3446_s30 + $0x40] sm:$0xff] %vm280_vm0, %v2578_v19  ;;  %306 = vst.msk [vmem:[%s3446_s30 + $0x48] sm:$0xff] %vm280_vm0, %v2578_v19 }
  0xd3   : > { %744 = vmatmul.mubr.f32.gmra.mrb[26].mxu0 %v3121_v47  ;;  %2335 = vmatprep.subr.bf16.mxu1 %v2334_v41  ;;  %307 = vst.msk [vmem:[%s3446_s30 + $0x50] sm:$0xff] %vm280_vm0, %v2578_v19  ;;  %308 = vst.msk [vmem:[%s3446_s30 + $0x58] sm:$0xff] %vm280_vm0, %v2578_v19 }
  0xd4   : > { %2273 = vmatpush1.bf16.msra.mxu0 %v2272_v49  ;;  %749 = vmatprep.mubr.f32.mxu0 %v3126_v53  ;;  %309 = vst.msk [vmem:[%s3446_s30 + $0x60] sm:$0xff] %vm280_vm0, %v2578_v19  ;;  %310 = vst.msk [vmem:[%s3446_s30 + $0x68] sm:$0xff] %vm280_vm0, %v2578_v19 }
  0xd5   : > { %905 = vmatmul.mubr.f32.gmra.mrb[26].mxu1 %v3121_v47  ;;  %2275 = vmatprep.subr.bf16.mxu0 %v2274_v54  ;;  %311 = vst.msk [vmem:[%s3446_s30 + $0x70] sm:$0xff] %vm280_vm0, %v2578_v19  ;;  %312 = vst.msk [vmem:[%s3446_s30 + $0x78] sm:$0xff] %vm280_vm0, %v2578_v19 }
  0xd6   : > { %2337 = vmatpush1.bf16.msra.mxu1 %v2336_v59  ;;  %910 = vmatprep.mubr.f32.mxu1 %v3126_v53 }
  0xd7   : > { %750 = vmatmul.mubr.f32.gmra.mrb[28].mxu0 %v3137_v4  ;;  %2339 = vmatprep.subr.bf16.mxu1 %v2338_v0 }
  0xd8   : > { %2277 = vmatpush1.bf16.msra.mxu0 %v2276_v5  ;;  %755 = vmatprep.mubr.f32.mxu0 %v3142_v13 }
  0xd9   : > { %911 = vmatmul.mubr.f32.gmra.mrb[28].mxu1 %v3137_v4  ;;  %2279 = vmatprep.subr.bf16.mxu0 %v2278_v16 }
  0xda   : > { %2341 = vmatpush1.bf16.msra.mxu1 %v2340_v20  ;;  %916 = vmatprep.mubr.f32.mxu1 %v3142_v13 }
  0xdb   : > { %756 = vmatmul.mubr.f32.gmra.mrb[30].mxu0 %v3151_v26  ;;  %2343 = vmatprep.subr.bf16.mxu1 %v2342_v21 }
  0xdc   : > { %2281 = vmatpush1.bf16.msra.mxu0 %v2280_v30  ;;  %987 = vmatprep.mubr.f32.mxu0 %v2867_v10 }
  0xdd   : > { %917 = vmatmul.mubr.f32.gmra.mrb[30].mxu1 %v3151_v26 }
  0xde   : > { %2345 = vmatpush1.bf16.msra.mxu1 %v2344_v33  ;;  %1148 = vmatprep.mubr.f32.mxu1 %v2867_v10 }
  0xdf   : > { %988 = vmatmul.mubr.f32.vlgmr.msra.gmra.mrb[32].mxu0 %v2915_v14 }
  0xe0   : > { %993 = vmatprep.mubr.f32.mxu0 %v2919_v18 }
  0xe1   : > { %1149 = vmatmul.mubr.f32.vlgmr.msra.gmra.mrb[32].mxu1 %v2915_v14 }
  0xe2   : > { %1154 = vmatprep.mubr.f32.mxu1 %v2919_v18 }
  0xe3   : > { %994 = vmatmul.mubr.f32.gmra.mrb[34].mxu0 %v2929_v28 }
  0xe4   : > { %999 = vmatprep.mubr.f32.mxu0 %v2934_v32 }
  0xe5   : > { %1155 = vmatmul.mubr.f32.gmra.mrb[34].mxu1 %v2929_v28 }
  0xe6   : > { %1160 = vmatprep.mubr.f32.mxu1 %v2934_v32 }
  0xe7   : > { %1000 = vmatmul.mubr.f32.gmra.mrb[36].mxu0 %v2945_v42 }
  0xe8   : > { %1005 = vmatprep.mubr.f32.mxu0 %v2950_v46 }
  0xe9   : > { %1161 = vmatmul.mubr.f32.gmra.mrb[36].mxu1 %v2945_v42 }
  0xea   : > { %1166 = vmatprep.mubr.f32.mxu1 %v2950_v46 }
  0xeb   : > { %1006 = vmatmul.mubr.f32.gmra.mrb[38].mxu0 %v2961_v56 }
  0xec   : > { %1011 = vmatprep.mubr.f32.mxu0 %v2966_v60 }
  0xed   : > { %1167 = vmatmul.mubr.f32.gmra.mrb[38].mxu1 %v2961_v56 }
  0xee   : > { %1172 = vmatprep.mubr.f32.mxu1 %v2966_v60 }
  0xef   : > { %1012 = vmatmul.mubr.f32.gmra.mrb[40].mxu0 %v2977_v6 }
  0xf0   : > { %1017 = vmatprep.mubr.f32.mxu0 %v2982_v11 }
  0xf1   : > { %1173 = vmatmul.mubr.f32.gmra.mrb[40].mxu1 %v2977_v6 }
  0xf2   : > { %1178 = vmatprep.mubr.f32.mxu1 %v2982_v11 }
  0xf3   : > { %1018 = vmatmul.mubr.f32.gmra.mrb[42].mxu0 %v2993_v23 }
  0xf4   : > { %1023 = vmatprep.mubr.f32.mxu0 %v2998_v27 }
  0xf5   : > { %1179 = vmatmul.mubr.f32.gmra.mrb[42].mxu1 %v2993_v23 }
  0xf6   : > { %1184 = vmatprep.mubr.f32.mxu1 %v2998_v27 }
  0xf7   : > { %1024 = vmatmul.mubr.f32.gmra.mrb[44].mxu0 %v3009_v39 }
  0xf8   : > { %1029 = vmatprep.mubr.f32.mxu0 %v3014_v44 }
  0xf9   : > { %1185 = vmatmul.mubr.f32.gmra.mrb[44].mxu1 %v3009_v39 }
  0xfa   : > { %1190 = vmatprep.mubr.f32.mxu1 %v3014_v44 }
  0xfb   : > { %1030 = vmatmul.mubr.f32.gmra.mrb[46].mxu0 %v3025_v55 }
  0xfc   : > { %1035 = vmatprep.mubr.f32.mxu0 %v3030_v61 }
  0xfd   : > { %1191 = vmatmul.mubr.f32.gmra.mrb[46].mxu1 %v3025_v55 }
  0xfe   : > { %1196 = vmatprep.mubr.f32.mxu1 %v3030_v61 }
  0xff   : > { %1036 = vmatmul.mubr.f32.gmra.mrb[48].mxu0 %v3041_v8 }
 0x100   : > { %1041 = vmatprep.mubr.f32.mxu0 %v3046_v15 }
 0x101   : > { %1197 = vmatmul.mubr.f32.gmra.mrb[48].mxu1 %v3041_v8 }
 0x102   : > { %1202 = vmatprep.mubr.f32.mxu1 %v3046_v15 }
 0x103   : > { %1042 = vmatmul.mubr.f32.gmra.mrb[50].mxu0 %v3057_v29 }
 0x104   : > { %1047 = vmatprep.mubr.f32.mxu0 %v3062_v34 }
 0x105   : > { %1203 = vmatmul.mubr.f32.gmra.mrb[50].mxu1 %v3057_v29 }
 0x106   : > { %1208 = vmatprep.mubr.f32.mxu1 %v3062_v34 }
 0x107   : > { %1048 = vmatmul.mubr.f32.gmra.mrb[52].mxu0 %v3073_v48 }
 0x108   : > { %1053 = vmatprep.mubr.f32.mxu0 %v3078_v52 }
 0x109   : > { %1209 = vmatmul.mubr.f32.gmra.mrb[52].mxu1 %v3073_v48 }
 0x10a   : > { %1214 = vmatprep.mubr.f32.mxu1 %v3078_v52 }
 0x10b   : > { %1054 = vmatmul.mubr.f32.gmra.mrb[54].mxu0 %v3089_v2 }
 0x10c   : > { %1059 = vmatprep.mubr.f32.mxu0 %v3094_v7 }
 0x10d   : > { %1215 = vmatmul.mubr.f32.gmra.mrb[54].mxu1 %v3089_v2 }
 0x10e   : > { %1220 = vmatprep.mubr.f32.mxu1 %v3094_v7 }
 0x10f   : > { %1060 = vmatmul.mubr.f32.gmra.mrb[56].mxu0 %v3105_v24 }
 0x110   : > { %1065 = vmatprep.mubr.f32.mxu0 %v3110_v31 }
 0x111   : > { %1221 = vmatmul.mubr.f32.gmra.mrb[56].mxu1 %v3105_v24 }
 0x112   : > { %1226 = vmatprep.mubr.f32.mxu1 %v3110_v31 }
 0x113   : > { %1066 = vmatmul.mubr.f32.gmra.mrb[58].mxu0 %v3121_v47 }
 0x114   : > { %1071 = vmatprep.mubr.f32.mxu0 %v3126_v53 }
 0x115   : > { %1227 = vmatmul.mubr.f32.gmra.mrb[58].mxu1 %v3121_v47 }
 0x116   : > { %1232 = vmatprep.mubr.f32.mxu1 %v3126_v53 }
 0x117   : > { %1072 = vmatmul.mubr.f32.gmra.mrb[60].mxu0 %v3137_v4 }
 0x118   : > { %1077 = vmatprep.mubr.f32.mxu0 %v3142_v13 }
 0x119   : > { %1233 = vmatmul.mubr.f32.gmra.mrb[60].mxu1 %v3137_v4 }
 0x11a   : > { %1238 = vmatprep.mubr.f32.mxu1 %v3142_v13 }
 0x11b   : > { %1078 = vmatmul.mubr.f32.gmra.mrb[62].mxu0 %v3151_v26 }
 0x11d   : > { %1239 = vmatmul.mubr.f32.gmra.mrb[62].mxu1 %v3151_v26 }
 0x172   : > { %v667_v10 = vpop.f32.mrb[0].mxu0 }
 0x173   : > { %1245 = vst [vmem:[%s3222_s25] sm:$0xff] %v667_v10  ;;  %v1582_v14 = vmul.f32 %v667_v10, %v667_v10  ;;  %v669_v18 = vpop.f32.mrb[1].mxu0 }
 0x174   : > { %1246 = vst [vmem:[%s3222_s25 + $0x8] sm:$0xff] %v669_v18  ;;  %v1389_v28 = vadd.f32 %v669_v18, %v667_v10  ;;  %v1583_v32 = vmul.f32 %v669_v18, %v669_v18  ;;  %v828_v42 = vpop.f32.mrb[0].mxu1 }
 0x175   : > { %1247 = vst [vmem:[%s3222_s25 + $0x10] sm:$0xff] %v828_v42  ;;  %v1584_v46 = vmul.f32 %v828_v42, %v828_v42  ;;  %v830_v56 = vpop.f32.mrb[1].mxu1 }
 0x176   : > { %v1710_v60 = vadd.f32 %v1583_v32, %v1582_v14  ;;  %v1390_v6 = vadd.f32 %v1389_v28, %v828_v42  ;;  %v673_v11 = vpop.f32.mrb[2].mxu0  ;;  %1248 = vst [vmem:[%s3222_s25 + $0x18] sm:$0xff] %v830_v56  ;;  %v1585_v23 = vmul.f32 %v830_v56, %v830_v56 }
 0x177   : > { %1253 = vst [vmem:[%s3222_s25 + $0x40] sm:$0xff] %v673_v11  ;;  %v1590_v27 = vmul.f32 %v673_v11, %v673_v11  ;;  %v675_v39 = vpop.f32.mrb[3].mxu0 }
 0x178   : > { %v1711_v44 = vadd.f32 %v1710_v60, %v1584_v46  ;;  %1254 = vst [vmem:[%s3222_s25 + $0x48] sm:$0xff] %v675_v39  ;;  %v1398_v55 = vadd.f32 %v675_v39, %v673_v11  ;;  %v1591_v61 = vmul.f32 %v675_v39, %v675_v39  ;;  %v3230_v8 = vadd.f32 %v1390_v6, %v830_v56  ;;  %v834_v15 = vpop.f32.mrb[2].mxu1 }
 0x179   : > { %1255 = vst [vmem:[%s3222_s25 + $0x50] sm:$0xff] %v834_v15  ;;  %v1592_v29 = vmul.f32 %v834_v15, %v834_v15  ;;  %v836_v34 = vpop.f32.mrb[3].mxu1 }
 0x17a   : > { %v1719_v48 = vadd.f32 %v1591_v61, %v1590_v27  ;;  %v3233_v52 = vadd.f32 %v1711_v44, %v1585_v23  ;;  %v1399_v2 = vadd.f32 %v1398_v55, %v834_v15  ;;  %v679_v7 = vpop.f32.mrb[4].mxu0  ;;  %1256 = vst [vmem:[%s3222_s25 + $0x58] sm:$0xff] %v836_v34  ;;  %v1593_v24 = vmul.f32 %v836_v34, %v836_v34 }
 0x17b   : > { %1261 = vst [vmem:[%s3222_s25 + $0x80] sm:$0xff] %v679_v7  ;;  %v1598_v31 = vmul.f32 %v679_v7, %v679_v7  ;;  %v681_v35 = vpop.f32.mrb[5].mxu0 }
 0x17c   : > { %v1720_v36 = vadd.f32 %v1719_v48, %v1592_v29  ;;  %1262 = vst [vmem:[%s3222_s25 + $0x88] sm:$0xff] %v681_v35  ;;  %v1407_v37 = vadd.f32 %v681_v35, %v679_v7  ;;  %v1599_v38 = vmul.f32 %v681_v35, %v681_v35  ;;  %v3238_v40 = vadd.f32 %v1399_v2, %v836_v34  ;;  %v840_v41 = vpop.f32.mrb[4].mxu1 }
 0x17d   : > { %1263 = vst [vmem:[%s3222_s25 + $0x90] sm:$0xff] %v840_v41  ;;  %v1600_v43 = vmul.f32 %v840_v41, %v840_v41  ;;  %v842_v45 = vpop.f32.mrb[5].mxu1 }
 0x17e   : > { %v1728_v47 = vadd.f32 %v1599_v38, %v1598_v31  ;;  %v3242_v49 = vadd.f32 %v1720_v36, %v1593_v24  ;;  %v1408_v50 = vadd.f32 %v1407_v37, %v840_v41  ;;  %v685_v51 = vpop.f32.mrb[6].mxu0  ;;  %1264 = vst [vmem:[%s3222_s25 + $0x98] sm:$0xff] %v842_v45  ;;  %v1601_v53 = vmul.f32 %v842_v45, %v842_v45 }
 0x17f   : > { %1269 = vst [vmem:[%s3222_s25 + $0xc0] sm:$0xff] %v685_v51  ;;  %v1606_v54 = vmul.f32 %v685_v51, %v685_v51  ;;  %v687_v57 = vpop.f32.mrb[7].mxu0 }
 0x180   : > { %v1729_v58 = vadd.f32 %v1728_v47, %v1600_v43  ;;  %1270 = vst [vmem:[%s3222_s25 + $0xc8] sm:$0xff] %v687_v57  ;;  %v1416_v59 = vadd.f32 %v687_v57, %v685_v51  ;;  %v1607_v62 = vmul.f32 %v687_v57, %v687_v57  ;;  %v3250_v63 = vadd.f32 %v1408_v50, %v842_v45  ;;  %v846_v0 = vpop.f32.mrb[6].mxu1 }
 0x181   : > { %1271 = vst [vmem:[%s3222_s25 + $0xd0] sm:$0xff] %v846_v0  ;;  %v1608_v1 = vmul.f32 %v846_v0, %v846_v0  ;;  %v848_v3 = vpop.f32.mrb[7].mxu1 }
 0x182   : > { %v1737_v4 = vadd.f32 %v1607_v62, %v1606_v54  ;;  %v3254_v5 = vadd.f32 %v1729_v58, %v1601_v53  ;;  %v1417_v9 = vadd.f32 %v1416_v59, %v846_v0  ;;  %v691_v12 = vpop.f32.mrb[8].mxu0  ;;  %1272 = vst [vmem:[%s3222_s25 + $0xd8] sm:$0xff] %v848_v3  ;;  %v1609_v13 = vmul.f32 %v848_v3, %v848_v3 }
 0x183   : > { %1277 = vst [vmem:[%s3222_s25 + $0x100] sm:$0xff] %v691_v12  ;;  %v1614_v16 = vmul.f32 %v691_v12, %v691_v12  ;;  %v693_v17 = vpop.f32.mrb[9].mxu0 }
 0x184   : > { %v1738_v20 = vadd.f32 %v1737_v4, %v1608_v1  ;;  %1278 = vst [vmem:[%s3222_s25 + $0x108] sm:$0xff] %v693_v17  ;;  %v1425_v21 = vadd.f32 %v693_v17, %v691_v12  ;;  %v1615_v22 = vmul.f32 %v693_v17, %v693_v17  ;;  %v3314_v25 = vadd.f32 %v1417_v9, %v848_v3  ;;  %v852_v26 = vpop.f32.mrb[8].mxu1 }
 0x185   : > { %1279 = vst [vmem:[%s3222_s25 + $0x110] sm:$0xff] %v852_v26  ;;  %v1616_v30 = vmul.f32 %v852_v26, %v852_v26  ;;  %v854_v33 = vpop.f32.mrb[9].mxu1 }
 0x186   : > { %v1746_v10 = vadd.f32 %v1615_v22, %v1614_v16  ;;  %v3317_v14 = vadd.f32 %v1738_v20, %v1609_v13  ;;  %v1426_v18 = vadd.f32 %v1425_v21, %v852_v26  ;;  %v697_v28 = vpop.f32.mrb[10].mxu0  ;;  %1280 = vst [vmem:[%s3222_s25 + $0x118] sm:$0xff] %v854_v33  ;;  %v1617_v32 = vmul.f32 %v854_v33, %v854_v33 }
 0x187   : > { %1285 = vst [vmem:[%s3222_s25 + $0x140] sm:$0xff] %v697_v28  ;;  %v1622_v42 = vmul.f32 %v697_v28, %v697_v28  ;;  %v699_v46 = vpop.f32.mrb[11].mxu0 }
 0x188   : > { %v1747_v56 = vadd.f32 %v1746_v10, %v1616_v30  ;;  %1286 = vst [vmem:[%s3222_s25 + $0x148] sm:$0xff] %v699_v46  ;;  %v1434_v60 = vadd.f32 %v699_v46, %v697_v28  ;;  %v1623_v6 = vmul.f32 %v699_v46, %v699_v46  ;;  %v3322_v11 = vadd.f32 %v1426_v18, %v854_v33  ;;  %v858_v23 = vpop.f32.mrb[10].mxu1 }
 0x189   : > { %1287 = vst [vmem:[%s3222_s25 + $0x150] sm:$0xff] %v858_v23  ;;  %v1624_v27 = vmul.f32 %v858_v23, %v858_v23  ;;  %v860_v39 = vpop.f32.mrb[11].mxu1 }
 0x18a   : > { %v1755_v44 = vadd.f32 %v1623_v6, %v1622_v42  ;;  %v3325_v55 = vadd.f32 %v1747_v56, %v1617_v32  ;;  %v1435_v61 = vadd.f32 %v1434_v60, %v858_v23  ;;  %v703_v15 = vpop.f32.mrb[12].mxu0  ;;  %1288 = vst [vmem:[%s3222_s25 + $0x158] sm:$0xff] %v860_v39  ;;  %v1625_v29 = vmul.f32 %v860_v39, %v860_v39 }
 0x18b   : > { %1293 = vst [vmem:[%s3222_s25 + $0x180] sm:$0xff] %v703_v15  ;;  %v1630_v34 = vmul.f32 %v703_v15, %v703_v15  ;;  %v705_v48 = vpop.f32.mrb[13].mxu0 }
 0x18c   : > { %v1756_v2 = vadd.f32 %v1755_v44, %v1624_v27  ;;  %1294 = vst [vmem:[%s3222_s25 + $0x188] sm:$0xff] %v705_v48  ;;  %v1443_v7 = vadd.f32 %v705_v48, %v703_v15  ;;  %v1631_v24 = vmul.f32 %v705_v48, %v705_v48  ;;  %v3330_v31 = vadd.f32 %v1435_v61, %v860_v39  ;;  %v864_v35 = vpop.f32.mrb[12].mxu1 }
 0x18d   : > { %1295 = vst [vmem:[%s3222_s25 + $0x190] sm:$0xff] %v864_v35  ;;  %v1632_v36 = vmul.f32 %v864_v35, %v864_v35  ;;  %v866_v37 = vpop.f32.mrb[13].mxu1 }
 0x18e   : > { %v1764_v38 = vadd.f32 %v1631_v24, %v1630_v34  ;;  %v3333_v41 = vadd.f32 %v1756_v2, %v1625_v29  ;;  %v1444_v43 = vadd.f32 %v1443_v7, %v864_v35  ;;  %v709_v45 = vpop.f32.mrb[14].mxu0  ;;  %1296 = vst [vmem:[%s3222_s25 + $0x198] sm:$0xff] %v866_v37  ;;  %v1633_v47 = vmul.f32 %v866_v37, %v866_v37 }
 0x18f   : > { %1301 = vst [vmem:[%s3222_s25 + $0x1c0] sm:$0xff] %v709_v45  ;;  %v1638_v50 = vmul.f32 %v709_v45, %v709_v45  ;;  %v711_v51 = vpop.f32.mrb[15].mxu0 }
 0x190   : > { %v1765_v53 = vadd.f32 %v1764_v38, %v1632_v36  ;;  %1302 = vst [vmem:[%s3222_s25 + $0x1c8] sm:$0xff] %v711_v51  ;;  %v1452_v54 = vadd.f32 %v711_v51, %v709_v45  ;;  %v1639_v57 = vmul.f32 %v711_v51, %v711_v51  ;;  %v3338_v58 = vadd.f32 %v1444_v43, %v866_v37  ;;  %v870_v59 = vpop.f32.mrb[14].mxu1 }
 0x191   : > { %1303 = vst [vmem:[%s3222_s25 + $0x1d0] sm:$0xff] %v870_v59  ;;  %v1640_v62 = vmul.f32 %v870_v59, %v870_v59  ;;  %v872_v0 = vpop.f32.mrb[15].mxu1 }
 0x192   : > { %v1773_v1 = vadd.f32 %v1639_v57, %v1638_v50  ;;  %v3341_v3 = vadd.f32 %v1765_v53, %v1633_v47  ;;  %v1453_v4 = vadd.f32 %v1452_v54, %v870_v59  ;;  %v715_v9 = vpop.f32.mrb[16].mxu0  ;;  %1304 = vst [vmem:[%s3222_s25 + $0x1d8] sm:$0xff] %v872_v0  ;;  %v1641_v12 = vmul.f32 %v872_v0, %v872_v0 }
 0x193   : > { %1309 = vst [vmem:[%s3222_s25 + $0x200] sm:$0xff] %v715_v9  ;;  %v1646_v13 = vmul.f32 %v715_v9, %v715_v9  ;;  %v717_v16 = vpop.f32.mrb[17].mxu0 }
 0x194   : > { %v1774_v17 = vadd.f32 %v1773_v1, %v1640_v62  ;;  %1310 = vst [vmem:[%s3222_s25 + $0x208] sm:$0xff] %v717_v16  ;;  %v1461_v20 = vadd.f32 %v717_v16, %v715_v9  ;;  %v1647_v21 = vmul.f32 %v717_v16, %v717_v16  ;;  %v3346_v22 = vadd.f32 %v1453_v4, %v872_v0  ;;  %v876_v26 = vpop.f32.mrb[16].mxu1 }
 0x195   : > { %1311 = vst [vmem:[%s3222_s25 + $0x210] sm:$0xff] %v876_v26  ;;  %v1648_v30 = vmul.f32 %v876_v26, %v876_v26  ;;  %v878_v33 = vpop.f32.mrb[17].mxu1 }
 0x196   : > { %v1782_v10 = vadd.f32 %v1647_v21, %v1646_v13  ;;  %v3349_v18 = vadd.f32 %v1774_v17, %v1641_v12  ;;  %v1462_v28 = vadd.f32 %v1461_v20, %v876_v26  ;;  %v721_v32 = vpop.f32.mrb[18].mxu0  ;;  %1312 = vst [vmem:[%s3222_s25 + $0x218] sm:$0xff] %v878_v33  ;;  %v1649_v42 = vmul.f32 %v878_v33, %v878_v33 }
 0x197   : > { %1317 = vst [vmem:[%s3222_s25 + $0x240] sm:$0xff] %v721_v32  ;;  %v1654_v46 = vmul.f32 %v721_v32, %v721_v32  ;;  %v723_v56 = vpop.f32.mrb[19].mxu0 }
 0x198   : > { %v1783_v60 = vadd.f32 %v1782_v10, %v1648_v30  ;;  %1318 = vst [vmem:[%s3222_s25 + $0x248] sm:$0xff] %v723_v56  ;;  %v1470_v6 = vadd.f32 %v723_v56, %v721_v32  ;;  %v1655_v23 = vmul.f32 %v723_v56, %v723_v56  ;;  %v3354_v27 = vadd.f32 %v1462_v28, %v878_v33  ;;  %v882_v39 = vpop.f32.mrb[18].mxu1 }
 0x199   : > { %1319 = vst [vmem:[%s3222_s25 + $0x250] sm:$0xff] %v882_v39  ;;  %v1656_v44 = vmul.f32 %v882_v39, %v882_v39  ;;  %v884_v61 = vpop.f32.mrb[19].mxu1 }
 0x19a   : > { %v1791_v15 = vadd.f32 %v1655_v23, %v1654_v46  ;;  %v3357_v29 = vadd.f32 %v1783_v60, %v1649_v42  ;;  %v1471_v34 = vadd.f32 %v1470_v6, %v882_v39  ;;  %v727_v48 = vpop.f32.mrb[20].mxu0  ;;  %1320 = vst [vmem:[%s3222_s25 + $0x258] sm:$0xff] %v884_v61  ;;  %v1657_v2 = vmul.f32 %v884_v61, %v884_v61 }
 0x19b   : > { %1325 = vst [vmem:[%s3222_s25 + $0x280] sm:$0xff] %v727_v48  ;;  %v1662_v7 = vmul.f32 %v727_v48, %v727_v48  ;;  %v729_v24 = vpop.f32.mrb[21].mxu0 }
 0x19c   : > { %v1792_v35 = vadd.f32 %v1791_v15, %v1656_v44  ;;  %1326 = vst [vmem:[%s3222_s25 + $0x288] sm:$0xff] %v729_v24  ;;  %v1479_v36 = vadd.f32 %v729_v24, %v727_v48  ;;  %v1663_v37 = vmul.f32 %v729_v24, %v729_v24  ;;  %v3362_v38 = vadd.f32 %v1471_v34, %v884_v61  ;;  %v888_v43 = vpop.f32.mrb[20].mxu1 }
 0x19d   : > { %1327 = vst [vmem:[%s3222_s25 + $0x290] sm:$0xff] %v888_v43  ;;  %v1664_v45 = vmul.f32 %v888_v43, %v888_v43  ;;  %v890_v47 = vpop.f32.mrb[21].mxu1 }
 0x19e   : > { %v1800_v50 = vadd.f32 %v1663_v37, %v1662_v7  ;;  %v3365_v51 = vadd.f32 %v1792_v35, %v1657_v2  ;;  %v1480_v53 = vadd.f32 %v1479_v36, %v888_v43  ;;  %v733_v54 = vpop.f32.mrb[22].mxu0  ;;  %1328 = vst [vmem:[%s3222_s25 + $0x298] sm:$0xff] %v890_v47  ;;  %v1665_v57 = vmul.f32 %v890_v47, %v890_v47 }
 0x19f   : > { %1333 = vst [vmem:[%s3222_s25 + $0x2c0] sm:$0xff] %v733_v54  ;;  %v1670_v59 = vmul.f32 %v733_v54, %v733_v54  ;;  %v735_v62 = vpop.f32.mrb[23].mxu0 }
 0x1a0   : > { %v1801_v0 = vadd.f32 %v1800_v50, %v1664_v45  ;;  %1334 = vst [vmem:[%s3222_s25 + $0x2c8] sm:$0xff] %v735_v62  ;;  %v1488_v1 = vadd.f32 %v735_v62, %v733_v54  ;;  %v1671_v4 = vmul.f32 %v735_v62, %v735_v62  ;;  %v3370_v9 = vadd.f32 %v1480_v53, %v890_v47  ;;  %v894_v12 = vpop.f32.mrb[22].mxu1 }
 0x1a1   : > { %1335 = vst [vmem:[%s3222_s25 + $0x2d0] sm:$0xff] %v894_v12  ;;  %v1672_v13 = vmul.f32 %v894_v12, %v894_v12  ;;  %v896_v16 = vpop.f32.mrb[23].mxu1 }
 0x1a2   : > { %v1809_v17 = vadd.f32 %v1671_v4, %v1670_v59  ;;  %v3373_v20 = vadd.f32 %v1801_v0, %v1665_v57  ;;  %v1489_v21 = vadd.f32 %v1488_v1, %v894_v12  ;;  %v739_v26 = vpop.f32.mrb[24].mxu0  ;;  %1336 = vst [vmem:[%s3222_s25 + $0x2d8] sm:$0xff] %v896_v16  ;;  %v1673_v30 = vmul.f32 %v896_v16, %v896_v16 }
 0x1a3   : > { %1341 = vst [vmem:[%s3222_s25 + $0x300] sm:$0xff] %v739_v26  ;;  %v1678_v33 = vmul.f32 %v739_v26, %v739_v26  ;;  %v741_v10 = vpop.f32.mrb[25].mxu0 }
 0x1a4   : > { %v1810_v28 = vadd.f32 %v1809_v17, %v1672_v13  ;;  %1342 = vst [vmem:[%s3222_s25 + $0x308] sm:$0xff] %v741_v10  ;;  %v1497_v32 = vadd.f32 %v741_v10, %v739_v26  ;;  %v1679_v42 = vmul.f32 %v741_v10, %v741_v10  ;;  %v3378_v46 = vadd.f32 %v1489_v21, %v896_v16  ;;  %v900_v56 = vpop.f32.mrb[24].mxu1 }
 0x1a5   : > { %1343 = vst [vmem:[%s3222_s25 + $0x310] sm:$0xff] %v900_v56  ;;  %v1680_v60 = vmul.f32 %v900_v56, %v900_v56  ;;  %v902_v6 = vpop.f32.mrb[25].mxu1 }
 0x1a6   : > { %v1818_v23 = vadd.f32 %v1679_v42, %v1678_v33  ;;  %v3381_v39 = vadd.f32 %v1810_v28, %v1673_v30  ;;  %v1498_v44 = vadd.f32 %v1497_v32, %v900_v56  ;;  %v745_v61 = vpop.f32.mrb[26].mxu0  ;;  %1344 = vst [vmem:[%s3222_s25 + $0x318] sm:$0xff] %v902_v6  ;;  %v1681_v15 = vmul.f32 %v902_v6, %v902_v6 }
 0x1a7   : > { %1349 = vst [vmem:[%s3222_s25 + $0x340] sm:$0xff] %v745_v61  ;;  %v1686_v34 = vmul.f32 %v745_v61, %v745_v61  ;;  %v747_v48 = vpop.f32.mrb[27].mxu0 }
 0x1a8   : > { %v1819_v2 = vadd.f32 %v1818_v23, %v1680_v60  ;;  %1350 = vst [vmem:[%s3222_s25 + $0x348] sm:$0xff] %v747_v48  ;;  %v1506_v7 = vadd.f32 %v747_v48, %v745_v61  ;;  %v1687_v24 = vmul.f32 %v747_v48, %v747_v48  ;;  %v3386_v35 = vadd.f32 %v1498_v44, %v902_v6  ;;  %v906_v36 = vpop.f32.mrb[26].mxu1 }
 0x1a9   : > { %1351 = vst [vmem:[%s3222_s25 + $0x350] sm:$0xff] %v906_v36  ;;  %v1688_v37 = vmul.f32 %v906_v36, %v906_v36  ;;  %v908_v43 = vpop.f32.mrb[27].mxu1 }
 0x1aa   : > { %v1827_v45 = vadd.f32 %v1687_v24, %v1686_v34  ;;  %v3389_v47 = vadd.f32 %v1819_v2, %v1681_v15  ;;  %v1507_v50 = vadd.f32 %v1506_v7, %v906_v36  ;;  %v751_v53 = vpop.f32.mrb[28].mxu0  ;;  %1352 = vst [vmem:[%s3222_s25 + $0x358] sm:$0xff] %v908_v43  ;;  %v1689_v54 = vmul.f32 %v908_v43, %v908_v43 }
 0x1ab   : > { %1357 = vst [vmem:[%s3222_s25 + $0x380] sm:$0xff] %v751_v53  ;;  %v1694_v57 = vmul.f32 %v751_v53, %v751_v53  ;;  %v753_v59 = vpop.f32.mrb[29].mxu0 }
 0x1ac   : > { %v1828_v62 = vadd.f32 %v1827_v45, %v1688_v37  ;;  %1358 = vst [vmem:[%s3222_s25 + $0x388] sm:$0xff] %v753_v59  ;;  %v1515_v0 = vadd.f32 %v753_v59, %v751_v53  ;;  %v1695_v1 = vmul.f32 %v753_v59, %v753_v59  ;;  %v3394_v4 = vadd.f32 %v1507_v50, %v908_v43  ;;  %v912_v12 = vpop.f32.mrb[28].mxu1 }
 0x1ad   : > { %1359 = vst [vmem:[%s3222_s25 + $0x390] sm:$0xff] %v912_v12  ;;  %v1696_v13 = vmul.f32 %v912_v12, %v912_v12  ;;  %v914_v16 = vpop.f32.mrb[29].mxu1 }
 0x1ae   : > { %v1836_v17 = vadd.f32 %v1695_v1, %v1694_v57  ;;  %v3397_v21 = vadd.f32 %v1828_v62, %v1689_v54  ;;  %v1516_v26 = vadd.f32 %v1515_v0, %v912_v12  ;;  %v757_v30 = vpop.f32.mrb[30].mxu0  ;;  %1360 = vst [vmem:[%s3222_s25 + $0x398] sm:$0xff] %v914_v16  ;;  %v1697_v33 = vmul.f32 %v914_v16, %v914_v16 }
 0x1af   : > { %1365 = vst [vmem:[%s3222_s25 + $0x3c0] sm:$0xff] %v757_v30  ;;  %v1702_v10 = vmul.f32 %v757_v30, %v757_v30  ;;  %v759_v28 = vpop.f32.mrb[31].mxu0 }
 0x1b0   : > { %v1837_v32 = vadd.f32 %v1836_v17, %v1696_v13  ;;  %1366 = vst [vmem:[%s3222_s25 + $0x3c8] sm:$0xff] %v759_v28  ;;  %v1524_v42 = vadd.f32 %v759_v28, %v757_v30  ;;  %v1703_v56 = vmul.f32 %v759_v28, %v759_v28  ;;  %v3402_v60 = vadd.f32 %v1516_v26, %v914_v16  ;;  %v918_v6 = vpop.f32.mrb[30].mxu1 }
 0x1b1   : > { %1367 = vst [vmem:[%s3222_s25 + $0x3d0] sm:$0xff] %v918_v6  ;;  %v1704_v23 = vmul.f32 %v918_v6, %v918_v6  ;;  %v920_v44 = vpop.f32.mrb[31].mxu1 }
 0x1b2   : > { %v1845_v61 = vadd.f32 %v1703_v56, %v1702_v10  ;;  %v3405_v15 = vadd.f32 %v1837_v32, %v1697_v33  ;;  %v1525_v34 = vadd.f32 %v1524_v42, %v918_v6  ;;  %v989_v48 = vpop.f32.mrb[32].mxu0  ;;  %1368 = vst [vmem:[%s3222_s25 + $0x3d8] sm:$0xff] %v920_v44  ;;  %v1705_v2 = vmul.f32 %v920_v44, %v920_v44 }
 0x1b3   : > { %1249 = vst [vmem:[%s3222_s25 + $0x20] sm:$0xff] %v989_v48  ;;  %v1392_v7 = vadd.f32 %v3230_v8, %v989_v48  ;;  %v1586_v24 = vmul.f32 %v989_v48, %v989_v48  ;;  %v991_v36 = vpop.f32.mrb[33].mxu0 }
 0x1b4   : > { %v1846_v37 = vadd.f32 %v1845_v61, %v1704_v23  ;;  %v3410_v43 = vadd.f32 %v1525_v34, %v920_v44  ;;  %1250 = vst [vmem:[%s3222_s25 + $0x28] sm:$0xff] %v991_v36  ;;  %v1587_v45 = vmul.f32 %v991_v36, %v991_v36  ;;  %v1150_v50 = vpop.f32.mrb[32].mxu1 }
 0x1b5   : > { %v1713_v53 = vadd.f32 %v3233_v52, %v1586_v24  ;;  %v1393_v54 = vadd.f32 %v1392_v7, %v991_v36  ;;  %1251 = vst [vmem:[%s3222_s25 + $0x30] sm:$0xff] %v1150_v50  ;;  %v1152_v57 = vpop.f32.mrb[33].mxu1  ;;  %v1588_v8 = vmul.f32 %v1150_v50, %v1150_v50 }
 0x1b6   : > { %v3415_v59 = vadd.f32 %v1846_v37, %v1705_v2  ;;  %v995_v62 = vpop.f32.mrb[34].mxu0  ;;  %1252 = vst [vmem:[%s3222_s25 + $0x38] sm:$0xff] %v1152_v57 }
 0x1b7   : > { %1257 = vst [vmem:[%s3222_s25 + $0x60] sm:$0xff] %v995_v62  ;;  %v1401_v0 = vadd.f32 %v3238_v40, %v995_v62  ;;  %v1594_v1 = vmul.f32 %v995_v62, %v995_v62  ;;  %v997_v12 = vpop.f32.mrb[35].mxu0  ;;  %v1394_v13 = vadd.f32 %v1393_v54, %v1150_v50  ;;  %v1714_v16 = vadd.f32 %v1713_v53, %v1587_v45 }
 0x1b8   : > { %1258 = vst [vmem:[%s3222_s25 + $0x68] sm:$0xff] %v997_v12  ;;  %v1595_v52 = vmul.f32 %v997_v12, %v997_v12  ;;  %v1156_v17 = vpop.f32.mrb[34].mxu1  ;;  %v1589_v40 = vmul.f32 %v1152_v57, %v1152_v57 }
 0x1b9   : > { %v1722_v26 = vadd.f32 %v3242_v49, %v1594_v1  ;;  %v1402_v30 = vadd.f32 %v1401_v0, %v997_v12  ;;  %1259 = vst [vmem:[%s3222_s25 + $0x70] sm:$0xff] %v1156_v17  ;;  %v1596_v33 = vmul.f32 %v1156_v17, %v1156_v17  ;;  %v1158_v10 = vpop.f32.mrb[35].mxu1  ;;  %v1395_v28 = vadd.f32 %v1394_v13, %v1152_v57 }
 0x1ba   : > { %v1001_v32 = vpop.f32.mrb[36].mxu0  ;;  %1260 = vst [vmem:[%s3222_s25 + $0x78] sm:$0xff] %v1158_v10  ;;  %v1715_v42 = vadd.f32 %v1714_v16, %v1588_v8  ;;  %v1597_v36 = vmul.f32 %v1158_v10, %v1158_v10 }
 0x1bb   : > { %1265 = vst [vmem:[%s3222_s25 + $0xa0] sm:$0xff] %v1001_v32  ;;  %v1410_v56 = vadd.f32 %v3250_v63, %v1001_v32  ;;  %v1602_v6 = vmul.f32 %v1001_v32, %v1001_v32  ;;  %1396 = vadd.xlane.f32.xlu0 %v1395_v28  ;;  %v1003_v23 = vpop.f32.mrb[37].mxu0  ;;  %v1723_v44 = vadd.f32 %v1722_v26, %v1595_v52 }
 0x1bc   : > { %v1403_v49 = vadd.f32 %v1402_v30, %v1156_v17  ;;  %1266 = vst [vmem:[%s3222_s25 + $0xa8] sm:$0xff] %v1003_v23  ;;  %v1603_v61 = vmul.f32 %v1003_v23, %v1003_v23  ;;  %v1162_v34 = vpop.f32.mrb[36].mxu1  ;;  %v1716_v48 = vadd.f32 %v1715_v42, %v1589_v40 }
 0x1bd   : > { %v1731_v2 = vadd.f32 %v3254_v5, %v1602_v6  ;;  %v1411_v7 = vadd.f32 %v1410_v56, %v1003_v23  ;;  %1267 = vst [vmem:[%s3222_s25 + $0xb0] sm:$0xff] %v1162_v34  ;;  %v1164_v24 = vpop.f32.mrb[37].mxu1  ;;  %v1724_v37 = vadd.f32 %v1723_v44, %v1596_v33  ;;  %v1604_v45 = vmul.f32 %v1162_v34, %v1162_v34 }
 0x1be   : > { %v1007_v63 = vpop.f32.mrb[38].mxu0  ;;  %1268 = vst [vmem:[%s3222_s25 + $0xb8] sm:$0xff] %v1164_v24  ;;  %v1404_v50 = vadd.f32 %v1403_v49, %v1158_v10  ;;  %v1605_v1 = vmul.f32 %v1164_v24, %v1164_v24 }
 0x1bf   : > { %1273 = vst [vmem:[%s3222_s25 + $0xe0] sm:$0xff] %v1007_v63  ;;  %v1419_v53 = vadd.f32 %v3314_v25, %v1007_v63  ;;  %v1610_v54 = vmul.f32 %v1007_v63, %v1007_v63  ;;  %1717 = vadd.xlane.f32.xlu0 %v1716_v48  ;;  %v1009_v57 = vpop.f32.mrb[39].mxu0  ;;  %v1725_v62 = vadd.f32 %v1724_v37, %v1597_v36 }
 0x1c0   : > { %v1412_v5 = vadd.f32 %v1411_v7, %v1162_v34  ;;  %1274 = vst [vmem:[%s3222_s25 + $0xe8] sm:$0xff] %v1009_v57  ;;  %v1611_v8 = vmul.f32 %v1009_v57, %v1009_v57  ;;  %v1168_v0 = vpop.f32.mrb[38].mxu1  ;;  %v1732_v12 = vadd.f32 %v1731_v2, %v1603_v61 }
 0x1c1   : > { %v1740_v13 = vadd.f32 %v3317_v14, %v1610_v54  ;;  %v1420_v16 = vadd.f32 %v1419_v53, %v1009_v57  ;;  %1726 = vadd.xlane.f32.xlu1 %v1725_v62  ;;  %1275 = vst [vmem:[%s3222_s25 + $0xf0] sm:$0xff] %v1168_v0  ;;  %v1170_v52 = vpop.f32.mrb[39].mxu1  ;;  %v1612_v26 = vmul.f32 %v1168_v0, %v1168_v0 }
 0x1c2   : > { %v1413_v25 = vadd.f32 %v1412_v5, %v1164_v24  ;;  %v1013_v17 = vpop.f32.mrb[40].mxu0  ;;  %1276 = vst [vmem:[%s3222_s25 + $0xf8] sm:$0xff] %v1170_v52  ;;  %v1733_v30 = vadd.f32 %v1732_v12, %v1604_v45  ;;  %v1613_v6 = vmul.f32 %v1170_v52, %v1170_v52 }
 0x1c3   : > { %1281 = vst [vmem:[%s3222_s25 + $0x120] sm:$0xff] %v1013_v17  ;;  %v1428_v33 = vadd.f32 %v3322_v11, %v1013_v17  ;;  %v1618_v10 = vmul.f32 %v1013_v17, %v1013_v17  ;;  %1405 = vadd.xlane.f32.xlu0 %v1404_v50  ;;  %v1015_v28 = vpop.f32.mrb[41].mxu0  ;;  %v1421_v32 = vadd.f32 %v1420_v16, %v1168_v0 }
 0x1c4   : > { %v1741_v14 = vadd.f32 %v1740_v13, %v1611_v8  ;;  %1282 = vst [vmem:[%s3222_s25 + $0x128] sm:$0xff] %v1015_v28  ;;  %v1619_v40 = vmul.f32 %v1015_v28, %v1015_v28  ;;  %v1174_v42 = vpop.f32.mrb[40].mxu1  ;;  %v1734_v56 = vadd.f32 %v1733_v30, %v1605_v1 }
 0x1c5   : > { %v1749_v23 = vadd.f32 %v3325_v55, %v1618_v10  ;;  %v1429_v44 = vadd.f32 %v1428_v33, %v1015_v28  ;;  %1414 = vadd.xlane.f32.xlu1 %v1413_v25  ;;  %1283 = vst [vmem:[%s3222_s25 + $0x130] sm:$0xff] %v1174_v42  ;;  %v1176_v49 = vpop.f32.mrb[41].mxu1  ;;  %v1422_v61 = vadd.f32 %v1421_v32, %v1170_v52 }
 0x1c6   : > { %v1019_v11 = vpop.f32.mrb[42].mxu0  ;;  %v1620_v55 = vmul.f32 %v1174_v42, %v1174_v42  ;;  %1284 = vst [vmem:[%s3222_s25 + $0x138] sm:$0xff] %v1176_v49  ;;  %v1742_v34 = vadd.f32 %v1741_v14, %v1612_v26  ;;  %v1621_v50 = vmul.f32 %v1176_v49, %v1176_v49 }
 0x1c7   : > { %1289 = vst [vmem:[%s3222_s25 + $0x160] sm:$0xff] %v1019_v11  ;;  %v1437_v48 = vadd.f32 %v3330_v31, %v1019_v11  ;;  %v1626_v2 = vmul.f32 %v1019_v11, %v1019_v11  ;;  %1735 = vadd.xlane.f32.xlu0 %v1734_v56  ;;  %v1021_v7 = vpop.f32.mrb[43].mxu0  ;;  %v1430_v24 = vadd.f32 %v1429_v44, %v1174_v42 }
 0x1c8   : > { %v1750_v36 = vadd.f32 %v1749_v23, %v1619_v40  ;;  %1290 = vst [vmem:[%s3222_s25 + $0x168] sm:$0xff] %v1021_v7  ;;  %v1627_v37 = vmul.f32 %v1021_v7, %v1021_v7  ;;  %v1180_v63 = vpop.f32.mrb[42].mxu1  ;;  %v1743_v45 = vadd.f32 %v1742_v34, %v1613_v6 }
 0x1c9   : > { %v1758_v53 = vadd.f32 %v3333_v41, %v1626_v2  ;;  %v1438_v54 = vadd.f32 %v1437_v48, %v1021_v7  ;;  %1423 = vadd.xlane.f32.xlu1 %v1422_v61  ;;  %1291 = vst [vmem:[%s3222_s25 + $0x170] sm:$0xff] %v1180_v63  ;;  %v1431_v19 = vadd.f32 %v1430_v24, %v1176_v49  ;;  %v1182_v31 = vpop.f32.mrb[43].mxu1 }
 0x1ca   : > { %v1025_v57 = vpop.f32.mrb[44].mxu0  ;;  %v1628_v62 = vmul.f32 %v1180_v63, %v1180_v63  ;;  %1292 = vst [vmem:[%s3222_s25 + $0x178] sm:$0xff] %v1182_v31  ;;  %v1751_v5 = vadd.f32 %v1750_v36, %v1620_v55  ;;  %v1629_v25 = vmul.f32 %v1182_v31, %v1182_v31 }
 0x1cb   : > { %1297 = vst [vmem:[%s3222_s25 + $0x1a0] sm:$0xff] %v1025_v57  ;;  %v1446_v8 = vadd.f32 %v3338_v58, %v1025_v57  ;;  %v1634_v0 = vmul.f32 %v1025_v57, %v1025_v57  ;;  %1432 = vadd.xlane.f32.xlu0 %v1431_v19  ;;  %v1027_v1 = vpop.f32.mrb[45].mxu0  ;;  %v1439_v12 = vadd.f32 %v1438_v54, %v1180_v63 }
 0x1cc   : > { %v1759_v41 = vadd.f32 %v1758_v53, %v1627_v37  ;;  %1298 = vst [vmem:[%s3222_s25 + $0x1a8] sm:$0xff] %v1027_v1  ;;  %v1635_v13 = vmul.f32 %v1027_v1, %v1027_v1  ;;  %v1186_v16 = vpop.f32.mrb[44].mxu1  ;;  %v1752_v52 = vadd.f32 %v1751_v5, %v1621_v50 }
 0x1cd   : > { %v1767_v17 = vadd.f32 %v3341_v3, %v1634_v0  ;;  %v1447_v26 = vadd.f32 %v1446_v8, %v1027_v1  ;;  %1744 = vadd.xlane.f32.xlu1 %v1743_v45  ;;  %1299 = vst [vmem:[%s3222_s25 + $0x1b0] sm:$0xff] %v1186_v16  ;;  %v1188_v30 = vpop.f32.mrb[45].mxu1  ;;  %v1440_v58 = vadd.f32 %v1439_v12, %v1182_v31 }
 0x1ce   : > { %v1031_v33 = vpop.f32.mrb[46].mxu0  ;;  %v1636_v10 = vmul.f32 %v1186_v16, %v1186_v16  ;;  %1300 = vst [vmem:[%s3222_s25 + $0x1b8] sm:$0xff] %v1188_v30  ;;  %v1760_v28 = vadd.f32 %v1759_v41, %v1628_v62  ;;  %v1637_v44 = vmul.f32 %v1188_v30, %v1188_v30 }
 0x1cf   : > { %1305 = vst [vmem:[%s3222_s25 + $0x1e0] sm:$0xff] %v1031_v33  ;;  %v1455_v32 = vadd.f32 %v3346_v22, %v1031_v33  ;;  %v1642_v14 = vmul.f32 %v1031_v33, %v1031_v33  ;;  %1753 = vadd.xlane.f32.xlu0 %v1752_v52  ;;  %v1033_v40 = vpop.f32.mrb[47].mxu0  ;;  %v1448_v42 = vadd.f32 %v1447_v26, %v1186_v16 }
 0x1d0   : > { %v1768_v3 = vadd.f32 %v1767_v17, %v1635_v13  ;;  %1306 = vst [vmem:[%s3222_s25 + $0x1e8] sm:$0xff] %v1033_v40  ;;  %v1643_v56 = vmul.f32 %v1033_v40, %v1033_v40  ;;  %v1192_v6 = vpop.f32.mrb[46].mxu1  ;;  %v1761_v23 = vadd.f32 %v1760_v28, %v1629_v25 }
 0x1d1   : > { %v1776_v49 = vadd.f32 %v3349_v18, %v1642_v14  ;;  %v1456_v61 = vadd.f32 %v1455_v32, %v1033_v40  ;;  %1441 = vadd.xlane.f32.xlu1 %v1440_v58  ;;  %1307 = vst [vmem:[%s3222_s25 + $0x1f0] sm:$0xff] %v1192_v6  ;;  %v1449_v11 = vadd.f32 %v1448_v42, %v1188_v30  ;;  %v1194_v22 = vpop.f32.mrb[47].mxu1 }
 0x1d2   : > { %v1037_v55 = vpop.f32.mrb[48].mxu0  ;;  %v1644_v34 = vmul.f32 %v1192_v6, %v1192_v6  ;;  %1308 = vst [vmem:[%s3222_s25 + $0x1f8] sm:$0xff] %v1194_v22  ;;  %v1769_v48 = vadd.f32 %v1768_v3, %v1636_v10  ;;  %v1645_v50 = vmul.f32 %v1194_v22, %v1194_v22 }
 0x1d3   : > { %1313 = vst [vmem:[%s3222_s25 + $0x220] sm:$0xff] %v1037_v55  ;;  %v1464_v2 = vadd.f32 %v3354_v27, %v1037_v55  ;;  %v1650_v7 = vmul.f32 %v1037_v55, %v1037_v55  ;;  %1450 = vadd.xlane.f32.xlu0 %v1449_v11  ;;  %v1039_v24 = vpop.f32.mrb[49].mxu0  ;;  %v1457_v36 = vadd.f32 %v1456_v61, %v1192_v6 }
 0x1d4   : > { %v1777_v18 = vadd.f32 %v1776_v49, %v1643_v56  ;;  %1314 = vst [vmem:[%s3222_s25 + $0x228] sm:$0xff] %v1039_v24  ;;  %v1651_v37 = vmul.f32 %v1039_v24, %v1039_v24  ;;  %v1198_v63 = vpop.f32.mrb[48].mxu1  ;;  %v1770_v45 = vadd.f32 %v1769_v48, %v1637_v44 }
 0x1d5   : > { %v1785_v53 = vadd.f32 %v3357_v29, %v1650_v7  ;;  %v1465_v54 = vadd.f32 %v1464_v2, %v1039_v24  ;;  %1762 = vadd.xlane.f32.xlu1 %v1761_v23  ;;  %1315 = vst [vmem:[%s3222_s25 + $0x230] sm:$0xff] %v1198_v63  ;;  %v1200_v19 = vpop.f32.mrb[49].mxu1  ;;  %v1458_v27 = vadd.f32 %v1457_v36, %v1194_v22 }
 0x1d6   : > { %v1043_v31 = vpop.f32.mrb[50].mxu0  ;;  %v1652_v57 = vmul.f32 %v1198_v63, %v1198_v63  ;;  %1316 = vst [vmem:[%s3222_s25 + $0x238] sm:$0xff] %v1200_v19  ;;  %v1778_v62 = vadd.f32 %v1777_v18, %v1644_v34  ;;  %v1653_v16 = vmul.f32 %v1200_v19, %v1200_v19 }
 0x1d7   : > { %1321 = vst [vmem:[%s3222_s25 + $0x260] sm:$0xff] %v1043_v31  ;;  %v1473_v5 = vadd.f32 %v3362_v38, %v1043_v31  ;;  %v1658_v8 = vmul.f32 %v1043_v31, %v1043_v31  ;;  %1771 = vadd.xlane.f32.xlu0 %v1770_v45  ;;  %v1045_v0 = vpop.f32.mrb[51].mxu0  ;;  %v1466_v1 = vadd.f32 %v1465_v54, %v1198_v63 }
 0x1d8   : > { %v1786_v29 = vadd.f32 %v1785_v53, %v1651_v37  ;;  %1322 = vst [vmem:[%s3222_s25 + $0x268] sm:$0xff] %v1045_v0  ;;  %v1659_v12 = vmul.f32 %v1045_v0, %v1045_v0  ;;  %v1204_v41 = vpop.f32.mrb[50].mxu1  ;;  %v1779_v13 = vadd.f32 %v1778_v62, %v1645_v50 }
 0x1d9   : > { %v1794_v52 = vadd.f32 %v3365_v51, %v1658_v8  ;;  %v1474_v25 = vadd.f32 %v1473_v5, %v1045_v0  ;;  %1459 = vadd.xlane.f32.xlu1 %v1458_v27  ;;  %1323 = vst [vmem:[%s3222_s25 + $0x270] sm:$0xff] %v1204_v41  ;;  %v1467_v17 = vadd.f32 %v1466_v1, %v1200_v19  ;;  %v1206_v38 = vpop.f32.mrb[51].mxu1 }
 0x1da   : > { %v1049_v26 = vpop.f32.mrb[52].mxu0  ;;  %v1660_v30 = vmul.f32 %v1204_v41, %v1204_v41  ;;  %1324 = vst [vmem:[%s3222_s25 + $0x278] sm:$0xff] %v1206_v38  ;;  %v1787_v58 = vadd.f32 %v1786_v29, %v1652_v57  ;;  %v1661_v3 = vmul.f32 %v1206_v38, %v1206_v38 }
 0x1db   : > { %1329 = vst [vmem:[%s3222_s25 + $0x2a0] sm:$0xff] %v1049_v26  ;;  %v1482_v33 = vadd.f32 %v3370_v9, %v1049_v26  ;;  %v1666_v10 = vmul.f32 %v1049_v26, %v1049_v26  ;;  %1468 = vadd.xlane.f32.xlu0 %v1467_v17  ;;  %v1051_v28 = vpop.f32.mrb[53].mxu0  ;;  %v1475_v32 = vadd.f32 %v1474_v25, %v1204_v41 }
 0x1dc   : > { %v1795_v51 = vadd.f32 %v1794_v52, %v1659_v12  ;;  %1330 = vst [vmem:[%s3222_s25 + $0x2a8] sm:$0xff] %v1051_v28  ;;  %v1667_v14 = vmul.f32 %v1051_v28, %v1051_v28  ;;  %v1210_v40 = vpop.f32.mrb[52].mxu1  ;;  %v1788_v42 = vadd.f32 %v1787_v58, %v1653_v16 }
 0x1dd   : > { %v1803_v56 = vadd.f32 %v3373_v20, %v1666_v10  ;;  %v1483_v6 = vadd.f32 %v1482_v33, %v1051_v28  ;;  %1780 = vadd.xlane.f32.xlu1 %v1779_v13  ;;  %1331 = vst [vmem:[%s3222_s25 + $0x2b0] sm:$0xff] %v1210_v40  ;;  %v1212_v23 = vpop.f32.mrb[53].mxu1  ;;  %v1476_v9 = vadd.f32 %v1475_v32, %v1206_v38 }
 0x1de   : > { %v1055_v44 = vpop.f32.mrb[54].mxu0  ;;  %v1668_v49 = vmul.f32 %v1210_v40, %v1210_v40  ;;  %1332 = vst [vmem:[%s3222_s25 + $0x2b8] sm:$0xff] %v1212_v23  ;;  %v1796_v61 = vadd.f32 %v1795_v51, %v1660_v30  ;;  %v1669_v24 = vmul.f32 %v1212_v23, %v1212_v23 }
 0x1df   : > { %1337 = vst [vmem:[%s3222_s25 + $0x2e0] sm:$0xff] %v1055_v44  ;;  %v1491_v11 = vadd.f32 %v3378_v46, %v1055_v44  ;;  %v1674_v22 = vmul.f32 %v1055_v44, %v1055_v44  ;;  %1789 = vadd.xlane.f32.xlu0 %v1788_v42  ;;  %v1057_v55 = vpop.f32.mrb[55].mxu0  ;;  %v1484_v34 = vadd.f32 %v1483_v6, %v1210_v40 }
 0x1e0   : > { %v1804_v20 = vadd.f32 %v1803_v56, %v1667_v14  ;;  %1338 = vst [vmem:[%s3222_s25 + $0x2e8] sm:$0xff] %v1057_v55  ;;  %v1675_v48 = vmul.f32 %v1057_v55, %v1057_v55  ;;  %v1216_v2 = vpop.f32.mrb[54].mxu1  ;;  %v1797_v7 = vadd.f32 %v1796_v61, %v1661_v3 }
 0x1e1   : > { %v1812_v36 = vadd.f32 %v3381_v39, %v1674_v22  ;;  %v1492_v18 = vadd.f32 %v1491_v11, %v1057_v55  ;;  %1477 = vadd.xlane.f32.xlu1 %v1476_v9  ;;  %1339 = vst [vmem:[%s3222_s25 + $0x2f0] sm:$0xff] %v1216_v2  ;;  %v1485_v37 = vadd.f32 %v1484_v34, %v1212_v23  ;;  %v1218_v46 = vpop.f32.mrb[55].mxu1 }
 0x1e2   : > { %v1061_v63 = vpop.f32.mrb[56].mxu0  ;;  %v1676_v45 = vmul.f32 %v1216_v2, %v1216_v2  ;;  %1340 = vst [vmem:[%s3222_s25 + $0x2f8] sm:$0xff] %v1218_v46  ;;  %v1805_v50 = vadd.f32 %v1804_v20, %v1668_v49  ;;  %v1677_v5 = vmul.f32 %v1218_v46, %v1218_v46 }
 0x1e3   : > { %1345 = vst [vmem:[%s3222_s25 + $0x320] sm:$0xff] %v1061_v63  ;;  %v1500_v53 = vadd.f32 %v3386_v35, %v1061_v63  ;;  %v1682_v54 = vmul.f32 %v1061_v63, %v1061_v63  ;;  %1486 = vadd.xlane.f32.xlu0 %v1485_v37  ;;  %v1063_v19 = vpop.f32.mrb[57].mxu0  ;;  %v1493_v27 = vadd.f32 %v1492_v18, %v1216_v2 }
 0x1e4   : > { %v1813_v39 = vadd.f32 %v1812_v36, %v1675_v48  ;;  %1346 = vst [vmem:[%s3222_s25 + $0x328] sm:$0xff] %v1063_v19  ;;  %v1683_v31 = vmul.f32 %v1063_v19, %v1063_v19  ;;  %v1222_v57 = vpop.f32.mrb[56].mxu1  ;;  %v1806_v62 = vadd.f32 %v1805_v50, %v1669_v24 }
 0x1e5   : > { %v1821_v8 = vadd.f32 %v3389_v47, %v1682_v54  ;;  %v1501_v0 = vadd.f32 %v1500_v53, %v1063_v19  ;;  %1798 = vadd.xlane.f32.xlu1 %v1797_v7  ;;  %1347 = vst [vmem:[%s3222_s25 + $0x330] sm:$0xff] %v1222_v57  ;;  %v1224_v1 = vpop.f32.mrb[57].mxu1  ;;  %v1494_v35 = vadd.f32 %v1493_v27, %v1218_v46 }
 0x1e6   : > { %v1067_v29 = vpop.f32.mrb[58].mxu0  ;;  %v1684_v12 = vmul.f32 %v1222_v57, %v1222_v57  ;;  %1348 = vst [vmem:[%s3222_s25 + $0x338] sm:$0xff] %v1224_v1  ;;  %v1814_v41 = vadd.f32 %v1813_v39, %v1676_v45  ;;  %v1685_v30 = vmul.f32 %v1224_v1, %v1224_v1 }
 0x1e7   : > { %1353 = vst [vmem:[%s3222_s25 + $0x360] sm:$0xff] %v1067_v29  ;;  %v1509_v13 = vadd.f32 %v3394_v4, %v1067_v29  ;;  %v1690_v16 = vmul.f32 %v1067_v29, %v1067_v29  ;;  %1807 = vadd.xlane.f32.xlu0 %v1806_v62  ;;  %v1069_v52 = vpop.f32.mrb[59].mxu0  ;;  %v1502_v25 = vadd.f32 %v1501_v0, %v1222_v57 }
 0x1e8   : > { %v1822_v47 = vadd.f32 %v1821_v8, %v1683_v31  ;;  %1354 = vst [vmem:[%s3222_s25 + $0x368] sm:$0xff] %v1069_v52  ;;  %v1691_v17 = vmul.f32 %v1069_v52, %v1069_v52  ;;  %v1228_v38 = vpop.f32.mrb[58].mxu1  ;;  %v1815_v26 = vadd.f32 %v1814_v41, %v1677_v5 }
 0x1e9   : > { %v1830_v58 = vadd.f32 %v3397_v21, %v1690_v16  ;;  %v1510_v33 = vadd.f32 %v1509_v13, %v1069_v52  ;;  %1495 = vadd.xlane.f32.xlu1 %v1494_v35  ;;  %1355 = vst [vmem:[%s3222_s25 + $0x370] sm:$0xff] %v1228_v38  ;;  %v1503_v10 = vadd.f32 %v1502_v25, %v1224_v1  ;;  %v1230_v4 = vpop.f32.mrb[59].mxu1 }
 0x1ea   : > { %v1073_v28 = vpop.f32.mrb[60].mxu0  ;;  %v1692_v32 = vmul.f32 %v1228_v38, %v1228_v38  ;;  %1356 = vst [vmem:[%s3222_s25 + $0x378] sm:$0xff] %v1230_v4  ;;  %v1823_v51 = vadd.f32 %v1822_v47, %v1684_v12  ;;  %v1693_v9 = vmul.f32 %v1230_v4, %v1230_v4 }
 0x1eb   : > { %1361 = vst [vmem:[%s3222_s25 + $0x3a0] sm:$0xff] %v1073_v28  ;;  %v1518_v14 = vadd.f32 %v3402_v60, %v1073_v28  ;;  %v1698_v40 = vmul.f32 %v1073_v28, %v1073_v28  ;;  %1504 = vadd.xlane.f32.xlu0 %v1503_v10  ;;  %v1075_v42 = vpop.f32.mrb[61].mxu0  ;;  %v1511_v3 = vadd.f32 %v1510_v33, %v1228_v38 }
 0x1ec   : > { %v1831_v21 = vadd.f32 %v1830_v58, %v1691_v17  ;;  %1362 = vst [vmem:[%s3222_s25 + $0x3a8] sm:$0xff] %v1075_v42  ;;  %v1699_v56 = vmul.f32 %v1075_v42, %v1075_v42  ;;  %v1234_v6 = vpop.f32.mrb[60].mxu1  ;;  %v1824_v23 = vadd.f32 %v1823_v51, %v1685_v30 }
 0x1ed   : > { %v1839_v44 = vadd.f32 %v3405_v15, %v1698_v40  ;;  %v1519_v49 = vadd.f32 %v1518_v14, %v1075_v42  ;;  %1816 = vadd.xlane.f32.xlu1 %v1815_v26  ;;  %1363 = vst [vmem:[%s3222_s25 + $0x3b0] sm:$0xff] %v1234_v6  ;;  %v1236_v61 = vpop.f32.mrb[61].mxu1  ;;  %v1512_v60 = vadd.f32 %v1511_v3, %v1230_v4 }
 0x1ee   : > { %v1079_v11 = vpop.f32.mrb[62].mxu0  ;;  %v1700_v22 = vmul.f32 %v1234_v6, %v1234_v6  ;;  %1364 = vst [vmem:[%s3222_s25 + $0x3b8] sm:$0xff] %v1236_v61  ;;  %v1832_v55 = vadd.f32 %v1831_v21, %v1692_v32  ;;  %v1701_v18 = vmul.f32 %v1236_v61, %v1236_v61 }
 0x1ef   : > { %1369 = vst [vmem:[%s3222_s25 + $0x3e0] sm:$0xff] %v1079_v11  ;;  %v1527_v34 = vadd.f32 %v3410_v43, %v1079_v11  ;;  %v1706_v20 = vmul.f32 %v1079_v11, %v1079_v11  ;;  %1825 = vadd.xlane.f32.xlu0 %v1824_v23  ;;  %v1081_v48 = vpop.f32.mrb[63].mxu0  ;;  %v1520_v2 = vadd.f32 %v1519_v49, %v1234_v6 }
 0x1f0   : > { %v1840_v15 = vadd.f32 %v1839_v44, %v1699_v56  ;;  %1370 = vst [vmem:[%s3222_s25 + $0x3e8] sm:$0xff] %v1081_v48  ;;  %v1707_v7 = vmul.f32 %v1081_v48, %v1081_v48  ;;  %v1240_v24 = vpop.f32.mrb[62].mxu1  ;;  %v1833_v36 = vadd.f32 %v1832_v55, %v1693_v9 }
 0x1f1   : > { %v1848_v37 = vadd.f32 %v3415_v59, %v1706_v20  ;;  %v1528_v46 = vadd.f32 %v1527_v34, %v1081_v48  ;;  %1513 = vadd.xlane.f32.xlu1 %v1512_v60  ;;  %1371 = vst [vmem:[%s3222_s25 + $0x3f0] sm:$0xff] %v1240_v24  ;;  %v1708_v63 = vmul.f32 %v1240_v24, %v1240_v24  ;;  %v1242_v43 = vpop.f32.mrb[63].mxu1 }
 0x1f2   : > { %v1521_v45 = vadd.f32 %v1520_v2, %v1236_v61  ;;  %1372 = vst [vmem:[%s3222_s25 + $0x3f8] sm:$0xff] %v1242_v43  ;;  %v1841_v50 = vadd.f32 %v1840_v15, %v1700_v22  ;;  %v1709_v54 = vmul.f32 %v1242_v43, %v1242_v43 }
 0x1f3   : > { %v1849_v53 = vadd.f32 %v1848_v37, %v1707_v7  ;;  %v1529_v19 = vadd.f32 %v1528_v46, %v1240_v24 }
 0x1f4   : > { %1522 = vadd.xlane.f32.xlu0 %v1521_v45  ;;  %v1842_v27 = vadd.f32 %v1841_v50, %v1701_v18 }
 0x1f5   : > { %1834 = vadd.xlane.f32.xlu1 %v1833_v36  ;;  %v1530_v39 = vadd.f32 %v1529_v19, %v1242_v43  ;;  %v1850_v59 = vadd.f32 %v1849_v53, %v1708_v63 }
 0x1f7   : > { %v1851_v31 = vadd.f32 %v1850_v59, %v1709_v54 }
 0x1f8   : > { %1843 = vadd.xlane.f32.xlu0 %v1842_v27 }
 0x1f9   : > { %1531 = vadd.xlane.f32.xlu1 %v1530_v39 }
 0x1fd   : > { %1852 = vadd.xlane.f32.xlu1 %v1851_v31 }
 0x1fe   : > { %2497 = shalt.err (!%p2494_p9)
}
 0x1ff   : > { %s2498_s25 = scalar_lea.hbm %s3568_s29, 16384  ;;  %s2502_s24 = scalar_lea.hbm %s3717_s2, 32768 }
 0x200   : > { %p2499_p1 = scmp.ne.s32.totalorder %s3568_s29, %s2498_s25  ;;  %p2503_p7 = scmp.lt.u32.totalorder %s3568_s29, %s3717_s2 }
 0x201   : > { %p2504_p13 = scmp.lt.u32.totalorder %s2502_s24, %s2498_s25  ;;  %p2506_p6 = scmp.lt.u32.totalorder %s2498_s25, %s3568_s29 }
 0x202   : > { %p2500_p2 = pnand %p2499_p1, %p2703_p10 }
 0x203   : > { %p2505_p4 = por %p2504_p13, %p2503_p7 }
 0x204   : > { %p2501_p3 = pneg %p2500_p2 }
 0x205   : > { %p2507_p8 = por %p2506_p6, %p2505_p4 }
 0x207   : > { %p2508_p12 = pnand %p2507_p8, %p2501_p3 }
 0x209   : > { %2511 = shalt.err (!%p2508_p12)
}
 0x20a   : > { %s2580_s12 = smov 1024   ;;  %s2581_s27 = smov 64   ;;  %v1373_v57 = vld [vmem:[%s3262_s28] sm:$0xff]  ;;  %v1567_v1 = vld [vmem:[%s3446_s30 + $0x8] sm:$0xff]  ;;  %v1375_v16 = vld [vmem:[%s3262_s28 + $0x10] sm:$0xff] }
 0x20b   : > { %2352 = dma.vmem_to_hbm [thread:$0]  (%p2703_p10), %s3570_s9, 16384, %s3568_s29, %s1887_s23, %s2580_s12, %s2580_s12, %s2581_s27  }
 0x20c   : > { %v1566_v8 = vld [vmem:[%s3446_s30] sm:$0xff]  ;;  %v1374_v12 = vld [vmem:[%s3262_s28 + $0x8] sm:$0xff]  ;;  %v1568_v47 = vld [vmem:[%s3446_s30 + $0x10] sm:$0xff] }
 0x20d   : > { %v1376_v26 = vld [vmem:[%s3262_s28 + $0x18] sm:$0xff]  ;;  %v1377_v33 = vld [vmem:[%s3262_s28 + $0x20] sm:$0xff]  ;;  %v1378_v3 = vld [vmem:[%s3262_s28 + $0x28] sm:$0xff] }
 0x20e   : > { %v1569_v28 = vld [vmem:[%s3446_s30 + $0x18] sm:$0xff]  ;;  %v1570_v14 = vld [vmem:[%s3446_s30 + $0x20] sm:$0xff]  ;;  %v1379_v6 = vld [vmem:[%s3262_s28 + $0x30] sm:$0xff] }
 0x20f   : > { %v1571_v44 = vld [vmem:[%s3446_s30 + $0x28] sm:$0xff]  ;;  %v1572_v60 = vld [vmem:[%s3446_s30 + $0x30] sm:$0xff]  ;;  %v1380_v55 = vld [vmem:[%s3262_s28 + $0x38] sm:$0xff] }
 0x210   : > { %v1381_v48 = vld [vmem:[%s3262_s28 + $0x40] sm:$0xff]  ;;  %v1573_v7 = vld [vmem:[%s3446_s30 + $0x38] sm:$0xff]  ;;  %v1382_v63 = vld [vmem:[%s3262_s28 + $0x48] sm:$0xff] }
 0x211   : > { %v1574_v18 = vld [vmem:[%s3446_s30 + $0x40] sm:$0xff]  ;;  %v1383_v50 = vld [vmem:[%s3262_s28 + $0x50] sm:$0xff]  ;;  %v1575_v19 = vld [vmem:[%s3446_s30 + $0x48] sm:$0xff] }
 0x212   : > { %v1576_v59 = vld [vmem:[%s3446_s30 + $0x50] sm:$0xff] }
 0x248   : > { %v1397_v62 = vpop.xlane.xlu0 %1396 }
 0x249   : > { %v1533_v5 = vadd.f32 %v1397_v62, %v1373_v57  ;;  %v1384_v62 = vld [vmem:[%s3262_s28 + $0x58] sm:$0xff] }
 0x24b   : > { %1550 = vst.msk [vmem:[%s3262_s28] sm:$0xff] %vm280_vm0, %v1533_v5 }
 0x24c   : > { %v1718_v0 = vpop.xlane.xlu0 %1717 }
 0x24d   : > { %v1854_v35 = vadd.f32 %v1718_v0, %v1566_v8  ;;  %v1385_v0 = vld [vmem:[%s3262_s28 + $0x60] sm:$0xff] }
 0x24e   : > { %v1727_v29 = vpop.xlane.xlu1 %1726 }
 0x24f   : > { %1870 = vst.msk [vmem:[%s3446_s30] sm:$0xff] %vm280_vm0, %v1854_v35  ;;  %v1855_v41 = vadd.f32 %v1727_v29, %v1567_v1  ;;  %v1577_v29 = vld [vmem:[%s3446_s30 + $0x58] sm:$0xff] }
 0x250   : > { %v1406_v13 = vpop.xlane.xlu0 %1405 }
 0x251   : > { %1871 = vst.msk [vmem:[%s3446_s30 + $0x8] sm:$0xff] %vm280_vm0, %v1855_v41  ;;  %v1534_v52 = vadd.f32 %v1406_v13, %v1374_v12  ;;  %v1578_v13 = vld [vmem:[%s3446_s30 + $0x60] sm:$0xff] }
 0x252   : > { %v1415_v25 = vpop.xlane.xlu1 %1414 }
 0x253   : > { %1551 = vst.msk [vmem:[%s3262_s28 + $0x8] sm:$0xff] %vm280_vm0, %v1534_v52  ;;  %v1535_v17 = vadd.f32 %v1415_v25, %v1375_v16  ;;  %v1386_v25 = vld [vmem:[%s3262_s28 + $0x68] sm:$0xff] }
 0x254   : > { %v1736_v38 = vpop.xlane.xlu0 %1735 }
 0x255   : > { %1552 = vst.msk [vmem:[%s3262_s28 + $0x10] sm:$0xff] %vm280_vm0, %v1535_v17  ;;  %v1856_v30 = vadd.f32 %v1736_v38, %v1568_v47  ;;  %v1387_v38 = vld [vmem:[%s3262_s28 + $0x70] sm:$0xff] }
 0x256   : > { %v1424_v58 = vpop.xlane.xlu1 %1423 }
 0x257   : > { %1872 = vst.msk [vmem:[%s3446_s30 + $0x10] sm:$0xff] %vm280_vm0, %v1856_v30  ;;  %v1536_v10 = vadd.f32 %v1424_v58, %v1376_v26  ;;  %v1579_v58 = vld [vmem:[%s3446_s30 + $0x68] sm:$0xff] }
 0x258   : > { %v1433_v4 = vpop.xlane.xlu0 %1432 }
 0x259   : > { %1553 = vst.msk [vmem:[%s3262_s28 + $0x18] sm:$0xff] %vm280_vm0, %v1536_v10  ;;  %v1537_v32 = vadd.f32 %v1433_v4, %v1377_v33  ;;  %v1580_v4 = vld [vmem:[%s3446_s30 + $0x70] sm:$0xff] }
 0x25a   : > { %v1745_v51 = vpop.xlane.xlu1 %1744 }
 0x25b   : > { %1554 = vst.msk [vmem:[%s3262_s28 + $0x20] sm:$0xff] %vm280_vm0, %v1537_v32  ;;  %v1857_v40 = vadd.f32 %v1745_v51, %v1569_v28  ;;  %v1388_v51 = vld [vmem:[%s3262_s28 + $0x78] sm:$0xff] }
 0x25c   : > { %v1754_v42 = vpop.xlane.xlu0 %1753 }
 0x25d   : > { %1873 = vst.msk [vmem:[%s3446_s30 + $0x18] sm:$0xff] %vm280_vm0, %v1857_v40  ;;  %v1858_v21 = vadd.f32 %v1754_v42, %v1570_v14 }
 0x25e   : > { %v1442_v56 = vpop.xlane.xlu1 %1441 }
 0x25f   : > { %1874 = vst.msk [vmem:[%s3446_s30 + $0x20] sm:$0xff] %vm280_vm0, %v1858_v21  ;;  %v1538_v23 = vadd.f32 %v1442_v56, %v1378_v3  ;;  %v1581_v3 = vld [vmem:[%s3446_s30 + $0x78] sm:$0xff] }
 0x260   : > { %v1451_v9 = vpop.xlane.xlu0 %1450 }
 0x261   : > { %1555 = vst.msk [vmem:[%s3262_s28 + $0x28] sm:$0xff] %vm280_vm0, %v1538_v23  ;;  %v1539_v49 = vadd.f32 %v1451_v9, %v1379_v6 }
 0x262   : > { %v1763_v61 = vpop.xlane.xlu1 %1762 }
 0x263   : > { %1556 = vst.msk [vmem:[%s3262_s28 + $0x30] sm:$0xff] %vm280_vm0, %v1539_v49  ;;  %v1859_v11 = vadd.f32 %v1763_v61, %v1571_v44 }
 0x264   : > { %v1772_v22 = vpop.xlane.xlu0 %1771 }
 0x265   : > { %1875 = vst.msk [vmem:[%s3446_s30 + $0x28] sm:$0xff] %vm280_vm0, %v1859_v11  ;;  %v1860_v34 = vadd.f32 %v1772_v22, %v1572_v60 }
 0x266   : > { %v1460_v20 = vpop.xlane.xlu1 %1459 }
 0x267   : > { %1876 = vst.msk [vmem:[%s3446_s30 + $0x30] sm:$0xff] %vm280_vm0, %v1860_v34  ;;  %v1540_v2 = vadd.f32 %v1460_v20, %v1380_v55 }
 0x268   : > { %v1469_v15 = vpop.xlane.xlu0 %1468 }
 0x269   : > { %1557 = vst.msk [vmem:[%s3262_s28 + $0x38] sm:$0xff] %vm280_vm0, %v1540_v2  ;;  %v1541_v24 = vadd.f32 %v1469_v15, %v1381_v48 }
 0x26a   : > { %v1781_v36 = vpop.xlane.xlu1 %1780 }
 0x26b   : > { %1558 = vst.msk [vmem:[%s3262_s28 + $0x40] sm:$0xff] %vm280_vm0, %v1541_v24  ;;  %v1861_v37 = vadd.f32 %v1781_v36, %v1573_v7 }
 0x26c   : > { %v1790_v46 = vpop.xlane.xlu0 %1789 }
 0x26d   : > { %1877 = vst.msk [vmem:[%s3446_s30 + $0x38] sm:$0xff] %vm280_vm0, %v1861_v37  ;;  %v1862_v45 = vadd.f32 %v1790_v46, %v1574_v18 }
 0x26e   : > { %v1478_v43 = vpop.xlane.xlu1 %1477 }
 0x26f   : > { %1878 = vst.msk [vmem:[%s3446_s30 + $0x40] sm:$0xff] %vm280_vm0, %v1862_v45  ;;  %v1542_v53 = vadd.f32 %v1478_v43, %v1382_v63 }
 0x270   : > { %v1487_v54 = vpop.xlane.xlu0 %1486 }
 0x271   : > { %1559 = vst.msk [vmem:[%s3262_s28 + $0x48] sm:$0xff] %vm280_vm0, %v1542_v53  ;;  %v1543_v27 = vadd.f32 %v1487_v54, %v1383_v50 }
 0x272   : > { %v1799_v39 = vpop.xlane.xlu1 %1798 }
 0x273   : > { %1560 = vst.msk [vmem:[%s3262_s28 + $0x50] sm:$0xff] %vm280_vm0, %v1543_v27  ;;  %v1863_v31 = vadd.f32 %v1799_v39, %v1575_v19 }
 0x274   : > { %v1808_v57 = vpop.xlane.xlu0 %1807 }
 0x275   : > { %1879 = vst.msk [vmem:[%s3446_s30 + $0x48] sm:$0xff] %vm280_vm0, %v1863_v31  ;;  %v1864_v5 = vadd.f32 %v1808_v57, %v1576_v59 }
 0x276   : > { %v1496_v8 = vpop.xlane.xlu1 %1495 }
 0x277   : > { %1880 = vst.msk [vmem:[%s3446_s30 + $0x50] sm:$0xff] %vm280_vm0, %v1864_v5  ;;  %v1544_v1 = vadd.f32 %v1496_v8, %v1384_v62 }
 0x278   : > { %v1505_v35 = vpop.xlane.xlu0 %1504 }
 0x279   : > { %1561 = vst.msk [vmem:[%s3262_s28 + $0x58] sm:$0xff] %vm280_vm0, %v1544_v1  ;;  %v1545_v12 = vadd.f32 %v1505_v35, %v1385_v0 }
 0x27a   : > { %v1817_v41 = vpop.xlane.xlu1 %1816 }
 0x27b   : > { %1562 = vst.msk [vmem:[%s3262_s28 + $0x60] sm:$0xff] %vm280_vm0, %v1545_v12  ;;  %v1865_v16 = vadd.f32 %v1817_v41, %v1577_v29 }
 0x27c   : > { %v1826_v52 = vpop.xlane.xlu0 %1825 }
 0x27d   : > { %1881 = vst.msk [vmem:[%s3446_s30 + $0x58] sm:$0xff] %vm280_vm0, %v1865_v16  ;;  %v1866_v47 = vadd.f32 %v1826_v52, %v1578_v13 }
 0x27e   : > { %v1514_v17 = vpop.xlane.xlu1 %1513 }
 0x27f   : > { %1882 = vst.msk [vmem:[%s3446_s30 + $0x60] sm:$0xff] %vm280_vm0, %v1866_v47  ;;  %v1546_v26 = vadd.f32 %v1514_v17, %v1386_v25 }
 0x281   : > { %v1523_v30 = vpop.xlane.xlu0 %1522  ;;  %1563 = vst.msk [vmem:[%s3262_s28 + $0x68] sm:$0xff] %vm280_vm0, %v1546_v26 }
 0x282   : > { %v1547_v33 = vadd.f32 %v1523_v30, %v1387_v38  ;;  %v1835_v10 = vpop.xlane.xlu1 %1834 }
 0x283   : > { %v1867_v28 = vadd.f32 %v1835_v10, %v1579_v58 }
 0x284   : > { %1564 = vst.msk [vmem:[%s3262_s28 + $0x70] sm:$0xff] %vm280_vm0, %v1547_v33 }
 0x285   : > { %v1844_v32 = vpop.xlane.xlu0 %1843  ;;  %1883 = vst.msk [vmem:[%s3446_s30 + $0x68] sm:$0xff] %vm280_vm0, %v1867_v28 }
 0x286   : > { %v1868_v14 = vadd.f32 %v1844_v32, %v1580_v4  ;;  %v1532_v40 = vpop.xlane.xlu1 %1531 }
 0x287   : > { %v1548_v42 = vadd.f32 %v1532_v40, %v1388_v51 }
 0x288   : > { %1884 = vst.msk [vmem:[%s3446_s30 + $0x70] sm:$0xff] %vm280_vm0, %v1868_v14 }
 0x289   : > { %1565 = vst.msk [vmem:[%s3262_s28 + $0x78] sm:$0xff] %vm280_vm0, %v1548_v42 }
 0x28a   : > { %v1853_v21 = vpop.xlane.xlu1 %1852 }
 0x28b   : > { %v1869_v56 = vadd.f32 %v1853_v21, %v1581_v3 }
 0x28d   : > { %1885 = vst.msk [vmem:[%s3446_s30 + $0x78] sm:$0xff] %vm280_vm0, %v1869_v56 }
 0x28e PF: > { %s1933_s8 = sand.u32 1, %s2550_s15   ;;  %p3737_p10 = scmp.ne.s32.totalorder %s3727_s26, 0 }
 0x28f   : > { %p3738_p11 = scmp.ge.s32.totalorder %s2570_s20, 2  ;;  %s1934_s7 = scalar_lea.sflag [#allocation4], %s1933_s8 }
 0x291   : > { %p2363_p0 = pnand %p3738_p11, %p3737_p10 }
 0x293   : > { %2545 = dma.done.wait (!%p2363_p0), %s1934_s7, 16384  }
 0x294   : > { %2547 = vsyncadd (!%p2363_p0), %s1934_s7, 4294950912  ;;  %s22_s20 = sadd.s32 1, %s2570_s20   ;;  %s3739_s15 = smov %s2554_s16 }
 0x295   : > { %p19_p5 = scmp.ge.s32.totalorder %s22_s20, 4   ;;  %s3740_s16 = smov %s2558_s17 }
 0x296   : > { %s3741_s17 = smov %s2712_s10  ;;  %s3742_s18 = smov %s2566_s19 }
 0x297   : > { %s3743_s19 = smov %s3745_s5  ;;  %21 = sbr.rel (!%p19_p5) target bundleno = 7 (0x7), region = 105 }
 0x29e   :  { %1955 = vsyncpa [#allocation3], 1 }
 0x29f   :  { %1957 = vsyncpa [#allocation3 + $0x1], 1 }
 0x2a0   :  { %1958 = vsyncpa [#allocation6], 1 }
 0x2a1   :  { %1959 = vsyncpa [#allocation4], 1 }
 0x2a2   :  { %1961 = vsyncpa [#allocation4 + $0x1], 1 }

</bundles_post_ra>
